<compile_context>
chip_gen: v7x
topology: tpu7x:2x2x1
jax: 0.10.0
libtpu: 0.0.40
codegen_flags: <defaults>
</compile_context>

<pallas_src>
import functools
import math

import jax
import jax.numpy as jnp
from jax.experimental import pallas as pl
from jax.experimental.pallas import tpu as pltpu


def _fused_attention_kernel(num_heads, scale,
                            q_ref, kv_ref, wq_ref, wk_ref, wv_ref, mask_ref, o_ref):
    """One batch tile per grid step.

    q_ref:    (BT, Lq, D)  query activations (f32)
    kv_ref:   (BT, Lv, D)  key/value activations (f32)
    wq/wk/wv: (D, D)       pre-transposed Linear weights in bf16 (so projection is x @ W)
    mask_ref: (BT, Lq, 1)  multiplicative mask (ones when attention_mask is None)
    o_ref:    (BT, Lq, D)  output
    """
    bt, lq, d = q_ref.shape
    _, lv, _ = kv_ref.shape
    dh = d // num_heads

    # --- QKV projections: one big MXU matmul each (M = BT*L), bf16 operands, f32 acc ---
    q2d = q_ref[...].reshape(bt * lq, d).astype(jnp.bfloat16)
    kv2d = kv_ref[...].reshape(bt * lv, d).astype(jnp.bfloat16)

    q_proj = jnp.dot(q2d, wq_ref[...], preferred_element_type=jnp.float32)   # (BT*Lq, D)
    k_proj = jnp.dot(kv2d, wk_ref[...], preferred_element_type=jnp.float32)  # (BT*Lv, D)
    v_proj = jnp.dot(kv2d, wv_ref[...], preferred_element_type=jnp.float32)  # (BT*Lv, D)

    # Fold 1/sqrt(d_head) and the multiplicative mask into Q once (mask depends only on
    # the query row, so (q*scale*mask) @ K^T == (q @ K^T) * scale * mask).
    q3 = (q_proj.reshape(bt, lq, d) * (mask_ref[...] * scale)).astype(jnp.bfloat16)
    k3 = k_proj.reshape(bt, lv, d).astype(jnp.bfloat16)
    v3 = v_proj.reshape(bt, lv, d).astype(jnp.bfloat16)

    # --- per-head attention, batched over the batch tile (static unroll, H is small) ---
    for h in range(num_heads):
        lo = h * dh
        qh = q3[:, :, lo:lo + dh]    # (BT, Lq, dh)
        kh = k3[:, :, lo:lo + dh]    # (BT, Lv, dh)
        vh = v3[:, :, lo:lo + dh]    # (BT, Lv, dh)

        # scores, batched over BT, contracting the head dim (no explicit transpose).
        s = jnp.einsum('bqd,bkd->bqk', qh, kh,
                       preferred_element_type=jnp.float32)                   # (BT, Lq, Lv)

        # numerically stable softmax over keys; divide goes to the EUP slot.
        s = s - jnp.max(s, axis=-1, keepdims=True)
        p = jnp.exp(s)
        p = p * pl.reciprocal(jnp.sum(p, axis=-1, keepdims=True), approx=True)

        oh = jnp.einsum('bqk,bkd->bqd', p.astype(jnp.bfloat16), vh,
                        preferred_element_type=jnp.float32)                  # (BT, Lq, dh)

        # write this head's slice directly into the output block (no list/concat epilogue).
        o_ref[:, :, lo:lo + dh] = oh.astype(o_ref.dtype)


def _pick_batch_tile(batch, q_len, kv_len, target_rows=256):
    """Largest divisor of `batch` that (a) keeps the grid >= 2 steps when batch >= 2
    (so v7x's two TensorCores both get work) and (b) keeps the per-step MXU M-dimension
    (and VMEM tile size) around `target_rows` rows."""
    best = 1
    longest = max(q_len, kv_len)
    for cand in range(1, batch + 1):
        if batch % cand:
            continue
        if batch >= 2 and batch // cand < 2:
            continue
        if cand * longest <= target_rows:
            best = cand
    return best


def attention_forward(query_tensor, value_tensor, wq, wk, wv, *,
                      num_heads, attention_mask=None, batch_tile=None):
    """JAX/Pallas equivalent of Attention.forward.

    query_tensor: (B, Lq, D) f32
    value_tensor: (B, Lv, D) f32
    wq/wk/wv:     (D, D) f32 in torch.nn.Linear layout (out_features, in_features)
    attention_mask: optional (B, Lq) — multiplied into the scores (torch semantics)
    returns: (B, Lq, D) f32
    """
    batch, q_len, dim = query_tensor.shape
    _, kv_len, _ = value_tensor.shape
    if dim % num_heads != 0:
        raise ValueError(f"dim({dim}) % attention_head_num({num_heads}) != 0")
    d_head = dim // num_heads
    scale = 1.0 / math.sqrt(float(d_head))

    if batch_tile is None:
        batch_tile = _pick_batch_tile(batch, q_len, kv_len)
    if batch % batch_tile != 0:
        raise ValueError(f"batch({batch}) % batch_tile({batch_tile}) != 0")
    grid = (batch // batch_tile,)

    # torch Linear computes x @ W^T; transpose + cast to bf16 once per call.
    # TODO(synk): store the weights pre-transposed (and in bf16) outside the forward path
    # so these three XLA ops disappear entirely at large D.
    wq_t = wq.T.astype(jnp.bfloat16)
    wk_t = wk.T.astype(jnp.bfloat16)
    wv_t = wv.T.astype(jnp.bfloat16)

    if attention_mask is None:
        mask = jnp.ones((batch, q_len, 1), dtype=jnp.float32)
    else:
        mask = attention_mask.astype(jnp.float32).reshape(batch, q_len, 1)

    kernel = functools.partial(_fused_attention_kernel, num_heads, scale)

    out = pl.pallas_call(
        kernel,
        out_shape=jax.ShapeDtypeStruct((batch, q_len, dim), query_tensor.dtype),
        grid=grid,
        in_specs=[
            pl.BlockSpec((batch_tile, q_len, dim), lambda b: (b, 0, 0)),   # queries
            pl.BlockSpec((batch_tile, kv_len, dim), lambda b: (b, 0, 0)),  # keys/values
            pl.BlockSpec((dim, dim), lambda b: (0, 0)),                    # Wq^T (fetched once)
            pl.BlockSpec((dim, dim), lambda b: (0, 0)),                    # Wk^T
            pl.BlockSpec((dim, dim), lambda b: (0, 0)),                    # Wv^T
            pl.BlockSpec((batch_tile, q_len, 1), lambda b: (b, 0, 0)),     # mask
        ],
        out_specs=pl.BlockSpec((batch_tile, q_len, dim), lambda b: (b, 0, 0)),
        compiler_params=pltpu.CompilerParams(
            dimension_semantics=("parallel",),   # batch-tile axis splits across TCs on v7x
        ),
    )(query_tensor, value_tensor, wq_t, wk_t, wv_t, mask)
    return out


def _attention_reference(query, value, wq, wk, wv, *, num_heads, attention_mask=None):
    """Plain-JAX re-implementation of the torch forward (f32, high-precision reference)."""
    b, q_len, d = query.shape
    _, kv_len, _ = value.shape
    d_head = d // num_heads
    hi = jax.lax.Precision.HIGHEST
    q = jnp.einsum("bqd,ed->bqe", query, wq, precision=hi)   # x @ W^T
    k = jnp.einsum("bkd,ed->bke", value, wk, precision=hi)
    v = jnp.einsum("bkd,ed->bke", value, wv, precision=hi)
    q = q.reshape(b, q_len, num_heads, d_head).transpose(0, 2, 1, 3)
    k = k.reshape(b, kv_len, num_heads, d_head).transpose(0, 2, 1, 3)
    v = v.reshape(b, kv_len, num_heads, d_head).transpose(0, 2, 1, 3)
    s = jnp.einsum("bhqd,bhkd->bhqk", q, k, precision=hi) / math.sqrt(float(d_head))
    if attention_mask is not None:
        s = s * attention_mask[:, None, :, None]
    p = jax.nn.softmax(s, axis=-1)
    o = jnp.einsum("bhqk,bhkd->bhqd", p, v, precision=hi)
    return o.transpose(0, 2, 1, 3).reshape(b, q_len, d)


if __name__ == "__main__":
    batch = 8
    q_len = 16
    kv_len = 24
    dim = 128          # lane-aligned hidden size
    num_heads = 4      # size_per_head = 32

    key = jax.random.PRNGKey(0)
    kq, kvk, kwq, kwk, kwv, kmask = jax.random.split(key, 6)

    query = jax.random.normal(kq, (batch, q_len, dim), dtype=jnp.float32)
    value = jax.random.normal(kvk, (batch, kv_len, dim), dtype=jnp.float32)

    w_scale = 1.0 / math.sqrt(dim)
    wq = w_scale * jax.random.normal(kwq, (dim, dim), dtype=jnp.float32)
    wk = w_scale * jax.random.normal(kwk, (dim, dim), dtype=jnp.float32)
    wv = w_scale * jax.random.normal(kwv, (dim, dim), dtype=jnp.float32)

    # Path 1: attention_mask=None (the torch forward's default).
    out = attention_forward(query, value, wq, wk, wv, num_heads=num_heads)
    out = jax.block_until_ready(out)
    ref = _attention_reference(query, value, wq, wk, wv, num_heads=num_heads)
    assert out.shape == (batch, q_len, dim)
    err = float(jnp.max(jnp.abs(out - ref)))
    # bf16 MXU operands with f32 accumulation vs an f32-HIGHEST reference.
    assert err < 5e-2, f"mismatch vs reference (no mask): max|err|={err}"

    # Path 2: multiplicative attention_mask of shape (B, Lq), as the torch code expands it.
    mask = (jax.random.uniform(kmask, (batch, q_len)) > 0.3).astype(jnp.float32)
    out_m = attention_forward(query, value, wq, wk, wv,
                              num_heads=num_heads, attention_mask=mask)
    out_m = jax.block_until_ready(out_m)
    ref_m = _attention_reference(query, value, wq, wk, wv,
                                 num_heads=num_heads, attention_mask=mask)
    err_m = float(jnp.max(jnp.abs(out_m - ref_m)))
    assert err_m < 5e-2, f"mismatch vs reference (mask): max|err|={err_m}"

    print("KERNEL_OK")
</pallas_src>

<mosaic_0001>
module attributes {stable_mosaic.version = 11 : i64} {
  func.func @_fused_attention_kernel(%arg0: i32, %arg1: memref<4x16x128xf32, #tpu.memory_space<vmem>>, %arg2: memref<4x24x128xf32, #tpu.memory_space<vmem>>, %arg3: memref<128x128xbf16, #tpu.memory_space<vmem>>, %arg4: memref<128x128xbf16, #tpu.memory_space<vmem>>, %arg5: memref<128x128xbf16, #tpu.memory_space<vmem>>, %arg6: memref<4x16x1xf32, #tpu.memory_space<vmem>>, %arg7: memref<4x16x128xf32, #tpu.memory_space<vmem>>) attributes {dimension_semantics = [#tpu.dimension_semantics<parallel>], iteration_bounds = array<i64: 2>, scalar_prefetch = 0 : i64, scratch_operands = 0 : i64, tpu.core_type = #tpu.core_type<tc>, window_params = [{transform_indices = @transform_0, window_bounds = array<i64: 4, 16, 128>}, {transform_indices = @transform_1, window_bounds = array<i64: 4, 24, 128>}, {pipeline_mode = #tpu.pipeline_mode<synchronous>, transform_indices = @transform_2, window_bounds = array<i64: 128, 128>}, {pipeline_mode = #tpu.pipeline_mode<synchronous>, transform_indices = @transform_3, window_bounds = array<i64: 128, 128>}, {pipeline_mode = #tpu.pipeline_mode<synchronous>, transform_indices = @transform_4, window_bounds = array<i64: 128, 128>}, {transform_indices = @transform_5, window_bounds = array<i64: 4, 16, 1>}, {transform_indices = @transform_6, window_bounds = array<i64: 4, 16, 128>}]} {
    %c0 = arith.constant 0 : index
    %c0_0 = arith.constant 0 : index
    %c0_1 = arith.constant 0 : index
    %0 = vector.load %arg1[%c0, %c0_0, %c0_1] : memref<4x16x128xf32, #tpu.memory_space<vmem>>, vector<4x16x128xf32>
    %1 = vector.shape_cast %0 : vector<4x16x128xf32> to vector<64x128xf32>
    %2 = arith.truncf %1 : vector<64x128xf32> to vector<64x128xbf16>
    %c0_2 = arith.constant 0 : index
    %c0_3 = arith.constant 0 : index
    %c0_4 = arith.constant 0 : index
    %3 = vector.load %arg2[%c0_2, %c0_3, %c0_4] : memref<4x24x128xf32, #tpu.memory_space<vmem>>, vector<4x24x128xf32>
    %4 = vector.shape_cast %3 : vector<4x24x128xf32> to vector<96x128xf32>
    %5 = arith.truncf %4 : vector<96x128xf32> to vector<96x128xbf16>
    %c0_5 = arith.constant 0 : index
    %c0_6 = arith.constant 0 : index
    %6 = vector.load %arg3[%c0_5, %c0_6] : memref<128x128xbf16, #tpu.memory_space<vmem>>, vector<128x128xbf16>
    %cst = arith.constant dense<0.000000e+00> : vector<64x128xf32>
    %7 = tpu.matmul %2, %6, %cst {dimension_numbers = #tpu.dot_dimension_numbers<[1], [0], [0], [1], [0, 0, 1, 1], [], []>} : vector<64x128xbf16>, vector<128x128xbf16>, vector<64x128xf32> -> vector<64x128xf32>
    %c0_7 = arith.constant 0 : index
    %c0_8 = arith.constant 0 : index
    %8 = vector.load %arg4[%c0_7, %c0_8] : memref<128x128xbf16, #tpu.memory_space<vmem>>, vector<128x128xbf16>
    %cst_9 = arith.constant dense<0.000000e+00> : vector<96x128xf32>
    %9 = tpu.matmul %5, %8, %cst_9 {dimension_numbers = #tpu.dot_dimension_numbers<[1], [0], [0], [1], [0, 0, 1, 1], [], []>} : vector<96x128xbf16>, vector<128x128xbf16>, vector<96x128xf32> -> vector<96x128xf32>
    %c0_10 = arith.constant 0 : index
    %c0_11 = arith.constant 0 : index
    %10 = vector.load %arg5[%c0_10, %c0_11] : memref<128x128xbf16, #tpu.memory_space<vmem>>, vector<128x128xbf16>
    %cst_12 = arith.constant dense<0.000000e+00> : vector<96x128xf32>
    %11 = tpu.matmul %5, %10, %cst_12 {dimension_numbers = #tpu.dot_dimension_numbers<[1], [0], [0], [1], [0, 0, 1, 1], [], []>} : vector<96x128xbf16>, vector<128x128xbf16>, vector<96x128xf32> -> vector<96x128xf32>
    %12 = vector.shape_cast %7 : vector<64x128xf32> to vector<4x16x128xf32>
    %c0_13 = arith.constant 0 : index
    %c0_14 = arith.constant 0 : index
    %c0_15 = arith.constant 0 : index
    %13 = vector.load %arg6[%c0_13, %c0_14, %c0_15] : memref<4x16x1xf32, #tpu.memory_space<vmem>>, vector<4x16x1xf32>
    %cst_16 = arith.constant 0.176776692 : f32
    %14 = vector.broadcast %cst_16 : f32 to vector<4x16x1xf32>
    %15 = arith.mulf %13, %14 : vector<4x16x1xf32>
    %16 = vector.broadcast %15 : vector<4x16x1xf32> to vector<4x16x128xf32>
    %17 = arith.mulf %12, %16 : vector<4x16x128xf32>
    %18 = arith.truncf %17 : vector<4x16x128xf32> to vector<4x16x128xbf16>
    %19 = vector.shape_cast %9 : vector<96x128xf32> to vector<4x24x128xf32>
    %20 = arith.truncf %19 : vector<4x24x128xf32> to vector<4x24x128xbf16>
    %21 = vector.shape_cast %11 : vector<96x128xf32> to vector<4x24x128xf32>
    %22 = arith.truncf %21 : vector<4x24x128xf32> to vector<4x24x128xbf16>
    %23 = vector.extract_strided_slice %18 {offsets = [0, 0, 0], sizes = [4, 16, 32], strides = [1, 1, 1]} : vector<4x16x128xbf16> to vector<4x16x32xbf16>
    %24 = vector.extract_strided_slice %20 {offsets = [0, 0, 0], sizes = [4, 24, 32], strides = [1, 1, 1]} : vector<4x24x128xbf16> to vector<4x24x32xbf16>
    %25 = vector.extract_strided_slice %22 {offsets = [0, 0, 0], sizes = [4, 24, 32], strides = [1, 1, 1]} : vector<4x24x128xbf16> to vector<4x24x32xbf16>
    "tpu.trace_start"() <{level = 10 : i32, message = "bqd,bkd->bqk"}> : () -> ()
    %cst_17 = arith.constant dense<0.000000e+00> : vector<4x16x24xf32>
    %26 = tpu.matmul %23, %24, %cst_17 {dimension_numbers = #tpu.dot_dimension_numbers<[2], [2], [1], [1], [0, 0, 0, 1, 1, 1], [0], [0]>} : vector<4x16x32xbf16>, vector<4x24x32xbf16>, vector<4x16x24xf32> -> vector<4x16x24xf32>
    "tpu.trace_stop"() : () -> ()
    %cst_18 = arith.constant dense<0xFF800000> : vector<4x16xf32>
    %27 = vector.multi_reduction <maximumf>, %26, %cst_18 [2] : vector<4x16x24xf32> to vector<4x16xf32>
    %28 = vector.shape_cast %27 : vector<4x16xf32> to vector<4x16x1xf32>
    %29 = vector.broadcast %28 : vector<4x16x1xf32> to vector<4x16x24xf32>
    %30 = arith.subf %26, %29 : vector<4x16x24xf32>
    %31 = math.exp %30 : vector<4x16x24xf32>
    %cst_19 = arith.constant dense<0.000000e+00> : vector<4x16xf32>
    %32 = vector.multi_reduction <add>, %31, %cst_19 [2] : vector<4x16x24xf32> to vector<4x16xf32>
    %33 = vector.shape_cast %32 : vector<4x16xf32> to vector<4x16x1xf32>
    %34 = tpu.reciprocal %33 {approx = true} : vector<4x16x1xf32> -> vector<4x16x1xf32>
    %35 = vector.broadcast %34 : vector<4x16x1xf32> to vector<4x16x24xf32>
    %36 = arith.mulf %31, %35 : vector<4x16x24xf32>
    %37 = arith.truncf %36 : vector<4x16x24xf32> to vector<4x16x24xbf16>
    "tpu.trace_start"() <{level = 10 : i32, message = "bqk,bkd->bqd"}> : () -> ()
    %cst_20 = arith.constant dense<0.000000e+00> : vector<4x16x32xf32>
    %38 = tpu.matmul %37, %25, %cst_20 {dimension_numbers = #tpu.dot_dimension_numbers<[2], [1], [1], [2], [0, 0, 0, 1, 1, 2], [0], [0]>} : vector<4x16x24xbf16>, vector<4x24x32xbf16>, vector<4x16x32xf32> -> vector<4x16x32xf32>
    "tpu.trace_stop"() : () -> ()
    %c0_21 = arith.constant 0 : index
    %c0_22 = arith.constant 0 : index
    %c0_23 = arith.constant 0 : index
    %39 = vector.load %arg7[%c0_21, %c0_22, %c0_23] : memref<4x16x128xf32, #tpu.memory_space<vmem>>, vector<4x16x32xf32>
    tpu.vector_store %arg7[%c0_21, %c0_22, %c0_23], %38 {strides = array<i32>} : memref<4x16x128xf32, #tpu.memory_space<vmem>>, vector<4x16x32xf32>,
    %40 = vector.extract_strided_slice %18 {offsets = [0, 0, 32], sizes = [4, 16, 32], strides = [1, 1, 1]} : vector<4x16x128xbf16> to vector<4x16x32xbf16>
    %41 = vector.extract_strided_slice %20 {offsets = [0, 0, 32], sizes = [4, 24, 32], strides = [1, 1, 1]} : vector<4x24x128xbf16> to vector<4x24x32xbf16>
    %42 = vector.extract_strided_slice %22 {offsets = [0, 0, 32], sizes = [4, 24, 32], strides = [1, 1, 1]} : vector<4x24x128xbf16> to vector<4x24x32xbf16>
    "tpu.trace_start"() <{level = 10 : i32, message = "bqd,bkd->bqk"}> : () -> ()
    %cst_24 = arith.constant dense<0.000000e+00> : vector<4x16x24xf32>
    %43 = tpu.matmul %40, %41, %cst_24 {dimension_numbers = #tpu.dot_dimension_numbers<[2], [2], [1], [1], [0, 0, 0, 1, 1, 1], [0], [0]>} : vector<4x16x32xbf16>, vector<4x24x32xbf16>, vector<4x16x24xf32> -> vector<4x16x24xf32>
    "tpu.trace_stop"() : () -> ()
    %cst_25 = arith.constant dense<0xFF800000> : vector<4x16xf32>
    %44 = vector.multi_reduction <maximumf>, %43, %cst_25 [2] : vector<4x16x24xf32> to vector<4x16xf32>
    %45 = vector.shape_cast %44 : vector<4x16xf32> to vector<4x16x1xf32>
    %46 = vector.broadcast %45 : vector<4x16x1xf32> to vector<4x16x24xf32>
    %47 = arith.subf %43, %46 : vector<4x16x24xf32>
    %48 = math.exp %47 : vector<4x16x24xf32>
    %cst_26 = arith.constant dense<0.000000e+00> : vector<4x16xf32>
    %49 = vector.multi_reduction <add>, %48, %cst_26 [2] : vector<4x16x24xf32> to vector<4x16xf32>
    %50 = vector.shape_cast %49 : vector<4x16xf32> to vector<4x16x1xf32>
    %51 = tpu.reciprocal %50 {approx = true} : vector<4x16x1xf32> -> vector<4x16x1xf32>
    %52 = vector.broadcast %51 : vector<4x16x1xf32> to vector<4x16x24xf32>
    %53 = arith.mulf %48, %52 : vector<4x16x24xf32>
    %54 = arith.truncf %53 : vector<4x16x24xf32> to vector<4x16x24xbf16>
    "tpu.trace_start"() <{level = 10 : i32, message = "bqk,bkd->bqd"}> : () -> ()
    %cst_27 = arith.constant dense<0.000000e+00> : vector<4x16x32xf32>
    %55 = tpu.matmul %54, %42, %cst_27 {dimension_numbers = #tpu.dot_dimension_numbers<[2], [1], [1], [2], [0, 0, 0, 1, 1, 2], [0], [0]>} : vector<4x16x24xbf16>, vector<4x24x32xbf16>, vector<4x16x32xf32> -> vector<4x16x32xf32>
    "tpu.trace_stop"() : () -> ()
    %c0_28 = arith.constant 0 : index
    %c0_29 = arith.constant 0 : index
    %c32 = arith.constant 32 : index
    %56 = vector.load %arg7[%c0_28, %c0_29, %c32] : memref<4x16x128xf32, #tpu.memory_space<vmem>>, vector<4x16x32xf32>
    tpu.vector_store %arg7[%c0_28, %c0_29, %c32], %55 {strides = array<i32>} : memref<4x16x128xf32, #tpu.memory_space<vmem>>, vector<4x16x32xf32>,
    %57 = vector.extract_strided_slice %18 {offsets = [0, 0, 64], sizes = [4, 16, 32], strides = [1, 1, 1]} : vector<4x16x128xbf16> to vector<4x16x32xbf16>
    %58 = vector.extract_strided_slice %20 {offsets = [0, 0, 64], sizes = [4, 24, 32], strides = [1, 1, 1]} : vector<4x24x128xbf16> to vector<4x24x32xbf16>
    %59 = vector.extract_strided_slice %22 {offsets = [0, 0, 64], sizes = [4, 24, 32], strides = [1, 1, 1]} : vector<4x24x128xbf16> to vector<4x24x32xbf16>
    "tpu.trace_start"() <{level = 10 : i32, message = "bqd,bkd->bqk"}> : () -> ()
    %cst_30 = arith.constant dense<0.000000e+00> : vector<4x16x24xf32>
    %60 = tpu.matmul %57, %58, %cst_30 {dimension_numbers = #tpu.dot_dimension_numbers<[2], [2], [1], [1], [0, 0, 0, 1, 1, 1], [0], [0]>} : vector<4x16x32xbf16>, vector<4x24x32xbf16>, vector<4x16x24xf32> -> vector<4x16x24xf32>
    "tpu.trace_stop"() : () -> ()
    %cst_31 = arith.constant dense<0xFF800000> : vector<4x16xf32>
    %61 = vector.multi_reduction <maximumf>, %60, %cst_31 [2] : vector<4x16x24xf32> to vector<4x16xf32>
    %62 = vector.shape_cast %61 : vector<4x16xf32> to vector<4x16x1xf32>
    %63 = vector.broadcast %62 : vector<4x16x1xf32> to vector<4x16x24xf32>
    %64 = arith.subf %60, %63 : vector<4x16x24xf32>
    %65 = math.exp %64 : vector<4x16x24xf32>
    %cst_32 = arith.constant dense<0.000000e+00> : vector<4x16xf32>
    %66 = vector.multi_reduction <add>, %65, %cst_32 [2] : vector<4x16x24xf32> to vector<4x16xf32>
    %67 = vector.shape_cast %66 : vector<4x16xf32> to vector<4x16x1xf32>
    %68 = tpu.reciprocal %67 {approx = true} : vector<4x16x1xf32> -> vector<4x16x1xf32>
    %69 = vector.broadcast %68 : vector<4x16x1xf32> to vector<4x16x24xf32>
    %70 = arith.mulf %65, %69 : vector<4x16x24xf32>
    %71 = arith.truncf %70 : vector<4x16x24xf32> to vector<4x16x24xbf16>
    "tpu.trace_start"() <{level = 10 : i32, message = "bqk,bkd->bqd"}> : () -> ()
    %cst_33 = arith.constant dense<0.000000e+00> : vector<4x16x32xf32>
    %72 = tpu.matmul %71, %59, %cst_33 {dimension_numbers = #tpu.dot_dimension_numbers<[2], [1], [1], [2], [0, 0, 0, 1, 1, 2], [0], [0]>} : vector<4x16x24xbf16>, vector<4x24x32xbf16>, vector<4x16x32xf32> -> vector<4x16x32xf32>
    "tpu.trace_stop"() : () -> ()
    %c0_34 = arith.constant 0 : index
    %c0_35 = arith.constant 0 : index
    %c64 = arith.constant 64 : index
    %73 = vector.load %arg7[%c0_34, %c0_35, %c64] : memref<4x16x128xf32, #tpu.memory_space<vmem>>, vector<4x16x32xf32>
    tpu.vector_store %arg7[%c0_34, %c0_35, %c64], %72 {strides = array<i32>} : memref<4x16x128xf32, #tpu.memory_space<vmem>>, vector<4x16x32xf32>,
    %74 = vector.extract_strided_slice %18 {offsets = [0, 0, 96], sizes = [4, 16, 32], strides = [1, 1, 1]} : vector<4x16x128xbf16> to vector<4x16x32xbf16>
    %75 = vector.extract_strided_slice %20 {offsets = [0, 0, 96], sizes = [4, 24, 32], strides = [1, 1, 1]} : vector<4x24x128xbf16> to vector<4x24x32xbf16>
    %76 = vector.extract_strided_slice %22 {offsets = [0, 0, 96], sizes = [4, 24, 32], strides = [1, 1, 1]} : vector<4x24x128xbf16> to vector<4x24x32xbf16>
    "tpu.trace_start"() <{level = 10 : i32, message = "bqd,bkd->bqk"}> : () -> ()
    %cst_36 = arith.constant dense<0.000000e+00> : vector<4x16x24xf32>
    %77 = tpu.matmul %74, %75, %cst_36 {dimension_numbers = #tpu.dot_dimension_numbers<[2], [2], [1], [1], [0, 0, 0, 1, 1, 1], [0], [0]>} : vector<4x16x32xbf16>, vector<4x24x32xbf16>, vector<4x16x24xf32> -> vector<4x16x24xf32>
    "tpu.trace_stop"() : () -> ()
    %cst_37 = arith.constant dense<0xFF800000> : vector<4x16xf32>
    %78 = vector.multi_reduction <maximumf>, %77, %cst_37 [2] : vector<4x16x24xf32> to vector<4x16xf32>
    %79 = vector.shape_cast %78 : vector<4x16xf32> to vector<4x16x1xf32>
    %80 = vector.broadcast %79 : vector<4x16x1xf32> to vector<4x16x24xf32>
    %81 = arith.subf %77, %80 : vector<4x16x24xf32>
    %82 = math.exp %81 : vector<4x16x24xf32>
    %cst_38 = arith.constant dense<0.000000e+00> : vector<4x16xf32>
    %83 = vector.multi_reduction <add>, %82, %cst_38 [2] : vector<4x16x24xf32> to vector<4x16xf32>
    %84 = vector.shape_cast %83 : vector<4x16xf32> to vector<4x16x1xf32>
    %85 = tpu.reciprocal %84 {approx = true} : vector<4x16x1xf32> -> vector<4x16x1xf32>
    %86 = vector.broadcast %85 : vector<4x16x1xf32> to vector<4x16x24xf32>
    %87 = arith.mulf %82, %86 : vector<4x16x24xf32>
    %88 = arith.truncf %87 : vector<4x16x24xf32> to vector<4x16x24xbf16>
    "tpu.trace_start"() <{level = 10 : i32, message = "bqk,bkd->bqd"}> : () -> ()
    %cst_39 = arith.constant dense<0.000000e+00> : vector<4x16x32xf32>
    %89 = tpu.matmul %88, %76, %cst_39 {dimension_numbers = #tpu.dot_dimension_numbers<[2], [1], [1], [2], [0, 0, 0, 1, 1, 2], [0], [0]>} : vector<4x16x24xbf16>, vector<4x24x32xbf16>, vector<4x16x32xf32> -> vector<4x16x32xf32>
    "tpu.trace_stop"() : () -> ()
    %c0_40 = arith.constant 0 : index
    %c0_41 = arith.constant 0 : index
    %c96 = arith.constant 96 : index
    %90 = vector.load %arg7[%c0_40, %c0_41, %c96] : memref<4x16x128xf32, #tpu.memory_space<vmem>>, vector<4x16x32xf32>
    tpu.vector_store %arg7[%c0_40, %c0_41, %c96], %89 {strides = array<i32>} : memref<4x16x128xf32, #tpu.memory_space<vmem>>, vector<4x16x32xf32>,
    return
  }
  func.func @transform_0(%arg0: i32) -> (i32, i32, i32) {
    %c0_i32 = arith.constant 0 : i32
    %c0_i32_0 = arith.constant 0 : i32
    %c0_i32_1 = arith.constant 0 : i32
    return %arg0, %c0_i32, %c0_i32_0 : i32, i32, i32
  }
  func.func @transform_1(%arg0: i32) -> (i32, i32, i32) {
    %c0_i32 = arith.constant 0 : i32
    %c0_i32_0 = arith.constant 0 : i32
    %c0_i32_1 = arith.constant 0 : i32
    return %arg0, %c0_i32, %c0_i32_0 : i32, i32, i32
  }
  func.func @transform_2(%arg0: i32) -> (i32, i32) {
    %c0_i32 = arith.constant 0 : i32
    %c0_i32_0 = arith.constant 0 : i32
    %c0_i32_1 = arith.constant 0 : i32
    return %c0_i32, %c0_i32_0 : i32, i32
  }
  func.func @transform_3(%arg0: i32) -> (i32, i32) {
    %c0_i32 = arith.constant 0 : i32
    %c0_i32_0 = arith.constant 0 : i32
    %c0_i32_1 = arith.constant 0 : i32
    return %c0_i32, %c0_i32_0 : i32, i32
  }
  func.func @transform_4(%arg0: i32) -> (i32, i32) {
    %c0_i32 = arith.constant 0 : i32
    %c0_i32_0 = arith.constant 0 : i32
    %c0_i32_1 = arith.constant 0 : i32
    return %c0_i32, %c0_i32_0 : i32, i32
  }
  func.func @transform_5(%arg0: i32) -> (i32, i32, i32) {
    %c0_i32 = arith.constant 0 : i32
    %c0_i32_0 = arith.constant 0 : i32
    %c0_i32_1 = arith.constant 0 : i32
    return %arg0, %c0_i32, %c0_i32_0 : i32, i32, i32
  }
  func.func @transform_6(%arg0: i32) -> (i32, i32, i32) {
    %c0_i32 = arith.constant 0 : i32
    %c0_i32_0 = arith.constant 0 : i32
    %c0_i32_1 = arith.constant 0 : i32
    return %arg0, %c0_i32, %c0_i32_0 : i32, i32, i32
  }
}

</mosaic_0001>

<bundles_post_ra>
// kernel: tpu_custom_call.1
= control target key start
LH: loop header
LB: loop body
LE: loop exit
PB: predicated region body
PF: predicated region fallthrough
CT: control target
= control target key end

     0   :  { %11 = vsyncpa [#allocation3], 0  ;;  %s5335_s0 = inlined_call_operand.vmem [shape: f32[8,16,128], index: 0, kind: input, shape index: {}]   ;;  %s5336_s1 = inlined_call_operand.hbm [shape: f32[8,24,128], index: 1, kind: input, shape index: {}]   ;;  %s5337_s2 = inlined_call_operand.hbm [shape: bf16[128,128], index: 2, kind: input, shape index: {}]   ;;  %s5338_s3 = inlined_call_operand.hbm [shape: bf16[128,128], index: 3, kind: input, shape index: {}]   ;;  %s5339_s4 = inlined_call_operand.hbm [shape: bf16[128,128], index: 4, kind: input, shape index: {}]   ;;  %s5340_s5 = inlined_call_operand.vmem [shape: f32[8,16,1], index: 5, kind: input, shape index: {}]   ;;  %s5341_s6 = inlined_call_operand.hbm [shape: f32[8,16,128], index: 6, kind: output, shape index: {}]  }
   0x1   :  { %13 = vsyncpa [#allocation3 + $0x1], 0 }
   0x2   :  { %14 = vsyncpa [#allocation6], 0 }
   0x3   :  { %15 = vsyncpa [#allocation9], 0 }
   0x4   :  { %16 = vsyncpa [#allocation4], 0 }
   0x5   :  { %18 = vsyncpa [#allocation4 + $0x1], 0  ;;  %s4294_s21 = smov 0   ;;  %s4296_s22 = smov 0  }
   0x6   :  { %s4298_s23 = smov 0   ;;  %s4300_s24 = smov 0  }
   0x7 LB: > { %s4315_s25 = sadd.s32 4294967295, %s4240_s24   ;;  %s3248_s26 = sadd.s32 4294967294, %s4240_s24   ;;  %s4240_s24 = sphi %s4300_s24, %s5364_s24   ;;  %s4236_s23 = sphi %s4298_s23, %s5363_s23   ;;  %s4232_s22 = sphi %s4296_s22, %s5362_s22   ;;  %s4228_s21 = sphi %s4294_s21, %s5361_s21  }
   0x8   : > { %p70_p0 = scmp.ne.s32.totalorder %s4232_s22, %s4228_s21  ;;  %p5342_p1 = scmp.eq.s32.totalorder %s4315_s25, 0 }
   0x9   : > { %p189_p3 = scmp.eq.s32.totalorder %s3248_s26, 1  ;;  %p3249_p5 = scmp.ge.s32.totalorder %s4240_s24, 1 }
   0xa   : > { %p4324_p4 = por %p5342_p1, %p70_p0  ;;  %p196_p7 = scmp.lt.s32.totalorder %s4240_s24, 3 }
   0xb   : > { %p4329_p6 = por %p189_p3, %p70_p0  ;;  %s4242_s30 = smov [#allocation5]  }
   0xc   : > { %s5345_s27 = scalar_select %p4324_p4, 1, 0 }
   0xd   : > { %s5346_s28 = scalar_select %p4329_p6, 1, 0 }
   0xe   : > { %p4334_p8 = pnand %p3249_p5, %p196_p7  ;;  %s208_s7 = sshll.u32 %s4242_s30, 4  ;;  %s4338_s7 = int_to_ptr.vmem [resolvable:$true] %s208_s7 }
   0xf   : > { %s4243_s9 = smov [#allocation7]   ;;  %s4244_s11 = smov [#allocation8]  }
  0x10   : > { %s5347_s29 = scalar_select %p4334_p8, 1, 0 }
  0x11   : > { %p3825_p9 = pneg %p4334_p8  ;;  %s221_s10 = sshll.u32 %s4243_s9, 4  ;;  %s4349_s10 = int_to_ptr.vmem [resolvable:$true] %s221_s10 }
  0x12   : > { %s4351_s12 = sshll.u32 %s4244_s11, 4  ;;  %s4052_s15 = scalar_lea.hbm %s5337_s2, 1024  ;;  %s235_s12 = int_to_ptr.vmem [resolvable:$true] %s4351_s12 }
  0x13   : > { %p4345_p11 = pnand %p3825_p9, %p5342_p1  ;;  %p4053_p12 = scmp.ne.s32.totalorder %s5337_s2, %s4052_s15 }
  0x14   : > { %p4059_p5 = scmp.lt.u32.totalorder %s4052_s15, %s5337_s2 }
  0x15   : > { %p4361_p13 = pneg %p4345_p11 }
  0x17   : > { %p4055_p0 = pnand %p4361_p13, %p4053_p12 }
  0x19   : > { %p4056_p3 = pneg %p4055_p0 }
  0x1b   : > { %p4061_p7 = pnand %p4059_p5, %p4056_p3 }
  0x1d   : > { %4064 = shalt.err (!%p4061_p7)
}
  0x1e   : > { %s4065_s26 = scalar_lea.vmem %s4338_s7, 1024  ;;  %p4073_p2 = scmp.lt.s32.totalorder %s4338_s7, %s4338_s7 }
  0x1f   : > { %p4066_p9 = scmp.ne.s32.totalorder %s4338_s7, %s4065_s26  ;;  %p4074_p6 = scmp.lt.s32.totalorder %s4065_s26, %s4065_s26 }
  0x21   : > { %p4068_p10 = pnand %p4066_p9, %p4361_p13  ;;  %p4075_p12 = por %p4074_p6, %p4073_p2 }
  0x23   : > { %p4069_p1 = pneg %p4068_p10 }
  0x25   : > { %p4076_p0 = pnand %p4075_p12, %p4069_p1 }
  0x27   : > { %4079 = shalt.err (!%p4076_p0)
}
  0x28   : > { %s4245_s30 = smov 64   ;;  %s4246_s9 = smov 4  }
  0x29   : > { %3828 = dma.hbm_to_vmem [thread:$0]  (!%p4345_p11), %s5337_s2, 1024, %s4338_s7, [#allocation6], %s4245_s30, %s4245_s30, %s4246_s9  }
  0x2a   : > { %s4080_s16 = scalar_lea.hbm %s5338_s3, 1024 }
  0x2b   : > { %p4081_p1 = scmp.ne.s32.totalorder %s5338_s3, %s4080_s16  ;;  %p4087_p10 = scmp.lt.u32.totalorder %s4080_s16, %s5338_s3 }
  0x2d   : > { %p4083_p2 = pnand %p4081_p1, %p4361_p13 }
  0x2f   : > { %p4084_p6 = pneg %p4083_p2 }
  0x31   : > { %p4089_p3 = pnand %p4087_p10, %p4084_p6 }
  0x33   : > { %4092 = shalt.err (!%p4089_p3)
}
  0x34   : > { %s4093_s7 = scalar_lea.vmem %s4349_s10, 1024  ;;  %p4101_p12 = scmp.lt.s32.totalorder %s4349_s10, %s4349_s10 }
  0x35   : > { %p4094_p5 = scmp.ne.s32.totalorder %s4349_s10, %s4093_s7  ;;  %p4102_p0 = scmp.lt.s32.totalorder %s4093_s7, %s4093_s7 }
  0x37   : > { %p4096_p7 = pnand %p4094_p5, %p4361_p13  ;;  %p4103_p1 = por %p4102_p0, %p4101_p12 }
  0x39   : > { %p4097_p9 = pneg %p4096_p7 }
  0x3b   : > { %p4104_p2 = pnand %p4103_p1, %p4097_p9 }
  0x3d   : > { %4107 = shalt.err (!%p4104_p2)
}
  0x3e   : > { %3831 = dma.hbm_to_vmem [thread:$0]  (!%p4345_p11), %s5338_s3, 1024, %s4349_s10, [#allocation6], %s4245_s30, %s4245_s30, %s4246_s9  }
  0x3f   : > { %s4108_s16 = scalar_lea.hbm %s5339_s4, 1024 }
  0x40   : > { %p4109_p6 = scmp.ne.s32.totalorder %s5339_s4, %s4108_s16  ;;  %p4115_p5 = scmp.lt.u32.totalorder %s4108_s16, %s5339_s4 }
  0x42   : > { %p4111_p10 = pnand %p4109_p6, %p4361_p13 }
  0x44   : > { %p4112_p3 = pneg %p4111_p10 }
  0x46   : > { %p4117_p7 = pnand %p4115_p5, %p4112_p3 }
  0x48   : > { %4120 = shalt.err (!%p4117_p7)
}
  0x49   : > { %s4121_s7 = scalar_lea.vmem %s235_s12, 1024  ;;  %p4129_p1 = scmp.lt.s32.totalorder %s235_s12, %s235_s12 }
  0x4a   : > { %p4122_p9 = scmp.ne.s32.totalorder %s235_s12, %s4121_s7  ;;  %p4130_p2 = scmp.lt.s32.totalorder %s4121_s7, %s4121_s7 }
  0x4c   : > { %p4124_p12 = pnand %p4122_p9, %p4361_p13  ;;  %p4131_p4 = por %p4130_p2, %p4129_p1 }
  0x4e   : > { %p4125_p0 = pneg %p4124_p12 }
  0x50   : > { %p4132_p8 = pnand %p4131_p4, %p4125_p0 }
  0x52   : > { %4135 = shalt.err (!%p4132_p8)
}
  0x53   : > { %3834 = dma.hbm_to_vmem [thread:$0]  (!%p4345_p11), %s5339_s4, 1024, %s235_s12, [#allocation9], %s4245_s30, %s4245_s30, %s4246_s9  }
  0x54   : > { %s4434_s18 = sadd.s32 1, %s4240_s24   ;;  %s57_s13 = sadd.s32 1, %s4236_s23 }
  0x55   : > { %s54_s8 = ssub.s32 %s4240_s24, %s4434_s18  ;;  %p64_p8 = scmp.ne.s32.totalorder %s4236_s23, %s4232_s22 }
  0x56   : > { %p55_p4 = scmp.eq.s32.totalorder %s54_s8, 0  ;;  %p65_p13 = scmp.eq.s32.totalorder %s4240_s24, 0 }
  0x57   : > { %p3846_p6 = scmp.lt.s32.totalorder %s4240_s24, 2  ;;  %p5350_p3 = scmp.eq.s32.totalorder %s4315_s25, 1 }
  0x58   : > { %s4444_s14 = scalar_select %p55_p4, %s4236_s23, %s57_s13  }
  0x59   : > { %p66_p10 = por %p65_p13, %p64_p8  ;;  %p4448_p5 = por %p5350_p3, %p64_p8 }
  0x5a   : > { %s258_s16 = sand.u32 1, %s4236_s23   ;;  %s3807_s17 = smul.u32 1536, %s4240_s24 }
  0x5b   : > { %s3806_s12 = smul.u32 96, %s258_s16  ;;  %p4459_p11 = pnand %p3846_p6, %p66_p10 }
  0x5c   : > { %s4457_s19 = scalar_lea.hbm %s5336_s1, %s3807_s17  ;;  %s4465_s10 = scalar_lea.sflag [#allocation3], %s258_s16 }
  0x5d   : > { %s262_s26 = scalar_lea.vmem [#allocation2], %s3806_s12  ;;  %s4136_s11 = scalar_lea.hbm %s4457_s19, 1536 }
  0x5e   : > { %s270_s7 = sshll.u32 %s262_s26, 4  ;;  %p4137_p7 = scmp.ne.s32.totalorder %s4457_s19, %s4136_s11  ;;  %s4463_s7 = int_to_ptr.vmem [resolvable:$true] %s270_s7 }
  0x5f   : > { %p4138_p9 = pneg %p4459_p11  ;;  %s4141_s17 = scalar_lea.hbm %s5336_s1, 3072 }
  0x60   : > { %p4142_p1 = scmp.lt.u32.totalorder %s4457_s19, %s5336_s1  ;;  %p4143_p2 = scmp.lt.u32.totalorder %s4141_s17, %s4136_s11 }
  0x61   : > { %p4139_p12 = pnand %p4138_p9, %p4137_p7  ;;  %p4145_p8 = scmp.lt.u32.totalorder %s4136_s11, %s4457_s19 }
  0x62   : > { %p4144_p4 = por %p4143_p2, %p4142_p1 }
  0x63   : > { %p4140_p0 = pneg %p4139_p12 }
  0x64   : > { %p4146_p13 = por %p4145_p8, %p4144_p4 }
  0x66   : > { %p4147_p6 = pnand %p4146_p13, %p4140_p0 }
  0x68   : > { %4150 = shalt.err (!%p4147_p6)
}
  0x69   : > { %s4151_s16 = scalar_lea.vmem %s4463_s7, 1536  ;;  %s4247_s12 = smov [#allocation2]  }
  0x6a   : > { %p4152_p10 = scmp.ne.s32.totalorder %s4463_s7, %s4151_s16  ;;  %s4156_s26 = sshll.u32 %s4247_s12, 4  ;;  %s4157_s26 = int_to_ptr.vmem [resolvable:$false] %s4156_s26 }
  0x6b   : > { %s4158_s8 = scalar_lea.vmem %s4157_s26, 3072  ;;  %p4159_p12 = scmp.lt.s32.totalorder %s4463_s7, %s4157_s26 }
  0x6c   : > { %p4154_p3 = pnand %p4152_p10, %p4138_p9  ;;  %p4160_p1 = scmp.lt.s32.totalorder %s4158_s8, %s4151_s16 }
  0x6e   : > { %p4155_p7 = pneg %p4154_p3  ;;  %p4161_p2 = por %p4160_p1, %p4159_p12 }
  0x70   : > { %p4162_p4 = pnand %p4161_p2, %p4155_p7 }
  0x72   : > { %4165 = shalt.err (!%p4162_p4)
}
  0x73   : > { %s4248_s11 = smov 128   ;;  %s4249_s13 = smov 8  }
  0x74   : > { %3838 = dma.hbm_to_vmem [thread:$0]  (!%p4459_p11), %s4457_s19, 1536, %s4463_s7, %s4465_s10, %s4248_s11, %s4248_s11, %s4249_s13  }
  0x75   : > { %p5353_p9 = scmp.ne.s32.totalorder %s5347_s29, 0 }
  0x76   : > { %s4496_s17 = sand.u32 (!%p5353_p9), 1, %s4232_s22   ;;  %p5354_p0 = scmp.ne.s32.totalorder (!%p5353_p9), %s5345_s27, 0 }
  0x77   : > { %292 = sbr.rel (%p5353_p9) target bundleno = 3126 (0xc36), region = 44  ;;  %s295_s9 = scalar_lea.sflag (!%p5353_p9), [#allocation3], %s4496_s17 }
  0x78   : > { %s3808_s30 = smul.u32 (!%p5353_p9), 96, %s4496_s17 }
  0x7a   : > { %s4500_s16 = scalar_lea.vmem (!%p5353_p9), [#allocation2], %s3808_s30 }
  0x7e   : > { %4211 = dma.done.wait (%p5354_p0), %s295_s9, 1536  }
  0x7f   : > { %4213 = vsyncadd (%p5354_p0), %s295_s9, 4294965760  ;;  %p5355_p11 = scmp.eq.s32.totalorder %s4315_s25, 0 }
  0x81   : > { %4215 = dma.done.wait (%p5355_p11), [#allocation6], 2048   ;;  %p5356_p8 = pmov %p5355_p11 }
  0x83   : > { %4217 = vsyncadd (%p5356_p8), [#allocation6], 4294965248  ;;  %p5357_p13 = pmov %p5356_p8 }
  0x84   : > { %p5358_p6 = pmov %p5356_p8 }
  0x85   : > { %4219 = dma.done.wait (%p5357_p13), [#allocation9], 1024  }
  0x86   : > { %4221 = vsyncadd (%p5358_p6), [#allocation9], 4294966272  ;;  %v4250_v0 = vmov 0   ;;  %v3900_v1 = vld [vmem:[#allocation7] sm:$0xff]   ;;  %v3901_v2 = vld [vmem:[#allocation7 + $0x8] sm:$0xff]   ;;  %s3262_s27 = sshll.u32 %s4315_s25, 2 }
  0x87   : > { %3899 = vset.pattern.permute.xlu1 %v4250_v0  ;;  %3898 = vset.pattern.permute.xlu0 %v4250_v0  ;;  %v3903_v3 = vld [vmem:[#allocation5] sm:$0xff]   ;;  %v3902_v4 = vld [vmem:[#allocation7 + $0x10] sm:$0xff]   ;;  %p352_p10 = scmp.lt.s32.totalorder %s3262_s27, 7  ;;  %v3905_v5 = vld [vmem:[#allocation5 + $0x8] sm:$0xff]   ;;  %vm4252_vm0 = vmmov 0   ;;  %vm901_vm1 = vcmask 261120  }
  0x88   : > { %3494 = vmatprep.subr.bf16.mxu1 %v3900_v1  ;;  %3470 = vmatprep.subr.bf16.mxu0 %v3903_v3  ;;  %v3907_v6 = vld [vmem:[#allocation5 + $0x10] sm:$0xff]   ;;  %v3904_v7 = vld [vmem:[#allocation7 + $0x18] sm:$0xff]   ;;  %v3906_v9 = vld [vmem:[#allocation7 + $0x20] sm:$0xff]   ;;  %vm1198_vm2 = vcmask 1043456   ;;  %vm1102_vm3 = vcmask 195584   ;;  %s4253_s8 = smov 96  }
  0x89   : > { %3495 = vmatpush3.bf16.msra.mxu1 %v3900_v1  ;;  %3471 = vmatpush3.bf16.msra.mxu0 %v3903_v3  ;;  %s5366_s27 = smov (!%p352_p10, %s3262_s27), 7  ;;  %v3909_v8 = vld [vmem:[#allocation5 + $0x18] sm:$0xff]   ;;  %v380_v10 = vld [vmem:[%s4500_s16] sm:$0xff]  ;;  %v381_v11 = vld [vmem:[%s4500_s16 + $0x8] sm:$0xff]  ;;  %s3261_s11 = sshll.u32 %s4496_s17, 6  ;;  %vm1968_vm4 = vcmask 523520  }
  0x8a   : > { %3496 = vmatprep.subr.bf16.mxu1 %v3901_v2  ;;  %3472 = vmatprep.subr.bf16.mxu0 %v3905_v5  ;;  %s3330_s29 = sshll.u32 %s5366_s27, 4  ;;  %v3911_v12 = vld [vmem:[#allocation5 + $0x20] sm:$0xff]   ;;  %v4517_v13 = vpack.c.bf16 %v381_v11, %v380_v10  ;;  %v3908_v14 = vld [vmem:[#allocation7 + $0x28] sm:$0xff]   ;;  %v3910_v18 = vld [vmem:[#allocation7 + $0x30] sm:$0xff]   ;;  %s4798_s13 = scalar_lea.vmem [#allocation10], %s3261_s11  ;;  %vm2533_vm5 = vcmask 785920  }
  0x8b   : > { %s4522_s7 = scalar_lea.vmem %s5335_s0, %s3330_s29  ;;  %v3913_v16 = vld [vmem:[#allocation5 + $0x28] sm:$0xff]   ;;  %s4530_s26 = scalar_lea.vmem %s5340_s5, %s3330_s29  ;;  %v3914_v20 = vld [vmem:[#allocation5 + $0x30] sm:$0xff]   ;;  %v3912_v26 = vld [vmem:[#allocation7 + $0x38] sm:$0xff]   ;;  %vm3098_vm6 = vcmask 1048320  }
  0x8c   : > { %3510 = vmatprep.mubr.bf16.mxu1 %v4517_v13  ;;  %v368_v15 = vld [vmem:[%s4522_s7] sm:$0xff]  ;;  %v369_v17 = vld [vmem:[%s4522_s7 + $0x8] sm:$0xff]  ;;  %v819_v21 = vld [vmem:[%s4530_s26 + $0x10] sm:$0xff]  ;;  %s4254_s30 = smov 64   ;;  %s4255_s9 = smov 32  }
  0x8d   : > { %3497 = vmatpush3.bf16.msra.mxu1 %v3901_v2  ;;  %3473 = vmatpush3.bf16.msra.mxu0 %v3905_v5  ;;  %v376_v19 = vpack.c.bf16 %v369_v17, %v368_v15  ;;  %v827_v22 = vmul.f32 0.17677669, %v819_v21  ;;  %v817_v23 = vld [vmem:[%s4530_s26] sm:$0xff]  ;;  %v820_v24 = vld [vmem:[%s4530_s26 + $0x18] sm:$0xff]  ;;  %v818_v25 = vld [vmem:[%s4530_s26 + $0x8] sm:$0xff]  ;;  %s3122_s27 = sshll.u32 %s4798_s13, 4  ;;  %s5287_s27 = int_to_ptr.vmem [resolvable:$true] %s3122_s27 }
  0x8e   : > { %3498 = vmatprep.subr.bf16.mxu1 %v3902_v4  ;;  %3474 = vmatprep.subr.bf16.mxu0 %v3907_v6  ;;  %v825_v27 = vmul.f32 0.17677669, %v817_v23  ;;  %v382_v28 = vld [vmem:[%s4500_s16 + $0x10] sm:$0xff]  ;;  %v383_v29 = vld [vmem:[%s4500_s16 + $0x18] sm:$0xff]  ;;  %v828_v30 = vmul.f32 0.17677669, %v820_v24 }
  0x8f   : > { %3486 = vmatprep.mubr.bf16.mxu0 %v376_v19  ;;  %845 = vperm.xlu1 %3899, %v827_v22   ;;  %v822_v31 = vld [vmem:[%s4530_s26 + $0x28] sm:$0xff]  ;;  %v3915_v32 = vld [vmem:[#allocation5 + $0x38] sm:$0xff]   ;;  %v384_v33 = vld [vmem:[%s4500_s16 + $0x20] sm:$0xff]  ;;  %v826_v35 = vmul.f32 0.17677669, %v818_v25  ;;  %v393_v43 = vpack.c.bf16 %v383_v29, %v382_v28  ;;  %s4256_s10 = smov [#allocation10]  }
  0x90   : > { %v385_v34 = vld [vmem:[%s4500_s16 + $0x28] sm:$0xff]  ;;  %835 = vperm.xlu0 %3898, %v825_v27   ;;  %v821_v36 = vld [vmem:[%s4530_s26 + $0x20] sm:$0xff]  ;;  %v370_v37 = vld [vmem:[%s4522_s7 + $0x10] sm:$0xff]  ;;  %v830_v39 = vmul.f32 0.17677669, %v822_v31  ;;  %s4170_s12 = sshll.u32 %s4256_s10, 4  ;;  %s4171_s12 = int_to_ptr.vmem [resolvable:$false] %s4170_s12 }
  0x91   : > { %3499 = vmatpush3.bf16.msra.mxu1 %v3902_v4  ;;  %3475 = vmatpush3.bf16.msra.mxu0 %v3907_v6  ;;  %v371_v38 = vld [vmem:[%s4522_s7 + $0x18] sm:$0xff]  ;;  %v372_v41 = vld [vmem:[%s4522_s7 + $0x20] sm:$0xff]  ;;  %v373_v42 = vld [vmem:[%s4522_s7 + $0x28] sm:$0xff]  ;;  %v829_v44 = vmul.f32 0.17677669, %v821_v36  ;;  %v394_v45 = vpack.c.bf16 %v385_v34, %v384_v33  ;;  %p4173_p1 = scmp.lt.s32.totalorder %s5287_s27, %s4171_s12 }
  0x92   : > { %3500 = vmatprep.subr.bf16.mxu1 %v3904_v7  ;;  %3476 = vmatprep.subr.bf16.mxu0 %v3909_v8  ;;  %v824_v40 = vld [vmem:[%s4530_s26 + $0x38] sm:$0xff]  ;;  %v823_v46 = vld [vmem:[%s4530_s26 + $0x30] sm:$0xff]  ;;  %v3916_v47 = vld [vmem:[#allocation8] sm:$0xff]   ;;  %v377_v48 = vpack.c.bf16 %v371_v38, %v370_v37  ;;  %v378_v50 = vpack.c.bf16 %v373_v42, %v372_v41  ;;  %s4172_s26 = scalar_lea.vmem %s4171_s12, 2048 }
  0x93   : > { %850 = vperm.xlu1 %3899, %v828_v30   ;;  %v832_v49 = vmul.f32 0.17677669, %v824_v40  ;;  %v386_v51 = vld [vmem:[%s4500_s16 + $0x30] sm:$0xff]  ;;  %v387_v52 = vld [vmem:[%s4500_s16 + $0x38] sm:$0xff]  ;;  %v831_v53 = vmul.f32 0.17677669, %v823_v46 }
  0x94   : > { %840 = vperm.xlu0 %3898, %v826_v35   ;;  %v3917_v54 = vld [vmem:[#allocation8 + $0x8] sm:$0xff]   ;;  %v388_v55 = vld [vmem:[%s4500_s16 + $0x40] sm:$0xff]  ;;  %v395_v57 = vpack.c.bf16 %v387_v52, %v386_v51  ;;  %v374_v58 = vld [vmem:[%s4522_s7 + $0x30] sm:$0xff] }
  0x95   : > { %3501 = vmatpush3.bf16.msra.mxu1 %v3904_v7  ;;  %3477 = vmatpush3.bf16.msra.mxu0 %v3909_v8  ;;  %v389_v56 = vld [vmem:[%s4500_s16 + $0x48] sm:$0xff]  ;;  %v375_v59 = vld [vmem:[%s4522_s7 + $0x38] sm:$0xff]  ;;  %v3918_v61 = vld [vmem:[#allocation8 + $0x10] sm:$0xff]   ;;  %v4251_v7 = vmov 0.0   ;;  %s4166_s7 = scalar_lea.vmem %s5287_s27, 1024 }
  0x96   : > { %3502 = vmatprep.subr.bf16.mxu1 %v3906_v9  ;;  %3478 = vmatprep.subr.bf16.mxu0 %v3911_v12  ;;  %v396_v60 = vpack.c.bf16 %v389_v56, %v388_v55  ;;  %v379_v62 = vpack.c.bf16 %v375_v59, %v374_v58  ;;  %v390_v63 = vld [vmem:[%s4500_s16 + $0x50] sm:$0xff]  ;;  %v391_v0 = vld [vmem:[%s4500_s16 + $0x58] sm:$0xff]  ;;  %v3920_v3 = vld [vmem:[#allocation8 + $0x20] sm:$0xff]   ;;  %s3333_s16 = sshll.u32 %s4315_s25, 10  ;;  %s3108_s25 = scalar_lea.sflag [#allocation4], %s4496_s17 }
  0x97   : > { %860 = vperm.xlu1 %3899, %v830_v39   ;;  %v3919_v1 = vld [vmem:[#allocation8 + $0x18] sm:$0xff]   ;;  %v397_v2 = vpack.c.bf16 %v391_v0, %v390_v63  ;;  %v3921_v4 = vld [vmem:[#allocation8 + $0x28] sm:$0xff]   ;;  %v3922_v5 = vld [vmem:[#allocation8 + $0x30] sm:$0xff]   ;;  %s5285_s20 = scalar_lea.hbm %s5341_s6, %s3333_s16  ;;  %p4167_p3 = scmp.ne.s32.totalorder %s5287_s27, %s4166_s7 }
  0x98   : > { %855 = vperm.xlu0 %3898, %v829_v44   ;;  %v3923_v6 = vld [vmem:[#allocation8 + $0x38] sm:$0xff]   ;;  %p4174_p2 = scmp.lt.s32.totalorder %s4172_s26, %s4166_s7 }
  0x99   : > { %3503 = vmatpush3.bf16.msra.mxu1 %v3906_v9  ;;  %3479 = vmatpush3.bf16.msra.mxu0 %v3911_v12  ;;  %p4168_p7 = pnand %p4167_p3, %p4448_p5 }
  0x9a   : > { %3504 = vmatprep.subr.bf16.mxu1 %v3908_v14  ;;  %3480 = vmatprep.subr.bf16.mxu0 %v3913_v16  ;;  %p4175_p4 = por %p4174_p2, %p4173_p1 }
  0x9b   : > { %870 = vperm.xlu1 %3899, %v832_v49   ;;  %p4169_p12 = pneg %p4168_p7 }
  0x9c   : > { %865 = vperm.xlu0 %3898, %v831_v53  }
  0x9d   : > { %3505 = vmatpush3.bf16.msra.mxu1 %v3908_v14  ;;  %3481 = vmatpush3.bf16.msra.mxu0 %v3913_v16  ;;  %p4176_p9 = pnand %p4175_p4, %p4169_p12 }
  0x9e   : > { %3506 = vmatprep.subr.bf16.mxu1 %v3910_v18  ;;  %3482 = vmatprep.subr.bf16.mxu0 %v3914_v20 }
  0xa1   : > { %3507 = vmatpush3.bf16.msra.mxu1 %v3910_v18  ;;  %3483 = vmatpush3.bf16.msra.mxu0 %v3914_v20 }
  0xa2   : > { %3508 = vmatprep.subr.bf16.mxu1 %v3912_v26  ;;  %3484 = vmatprep.subr.bf16.mxu0 %v3915_v32 }
  0xa5   : > { %3509 = vmatpush3.bf16.msra.mxu1 %v3912_v26  ;;  %3485 = vmatpush3.bf16.msra.mxu0 %v3915_v32 }
  0xa6   : > { %3522 = vmatprep.subr.bf16.mxu0 %v3916_v47  ;;  %3550 = vmatprep.subr.bf16.mxu1 %v4251_v7 }
  0xa8   : > { %3511 = vmatmul.mubr.bf16.vlgmr.msra.gmra.mrb[0].mxu1 %v393_v43  ;;  %3487 = vmatmul.mubr.bf16.vlgmr.msra.gmra.mrb[0].mxu0 %v377_v48 }
  0xa9   : > { %3514 = vmatprep.mubr.bf16.mxu1 %v394_v45  ;;  %3490 = vmatprep.mubr.bf16.mxu0 %v378_v50 }
  0xaa   : > { %3523 = vmatpush3.bf16.msra.mxu0 %v3916_v47 }
  0xab   : > { %3524 = vmatprep.subr.bf16.mxu0 %v3917_v54 }
  0xae   : > { %3525 = vmatpush3.bf16.msra.mxu0 %v3917_v54 }
  0xaf   : > { %3526 = vmatprep.subr.bf16.mxu0 %v3918_v61 }
  0xb0   : > { %3515 = vmatmul.mubr.bf16.gmra.mrb[4].mxu1 %v395_v57  ;;  %3491 = vmatmul.mubr.bf16.gmra.mrb[4].mxu0 %v379_v62 }
  0xb1   : > { %3518 = vmatprep.mubr.bf16.mxu1 %v396_v60  ;;  %3538 = vmatprep.mubr.bf16.mxu0 %v4517_v13 }
  0xb2   : > { %3527 = vmatpush3.bf16.msra.mxu0 %v3918_v61 }
  0xb3   : > { %3528 = vmatprep.subr.bf16.mxu0 %v3919_v1 }
  0xb6   : > { %3529 = vmatpush3.bf16.msra.mxu0 %v3919_v1 }
  0xb7   : > { %3530 = vmatprep.subr.bf16.mxu0 %v3920_v3 }
  0xb8   : > { %3519 = vmatmul.mubr.bf16.gmra.mrb[8].mxu1 %v397_v2 }
  0xb9   : > { %3554 = vmatprep.mubr.msk.bf16.mxu1 %vm4252_vm0, %v4251_v7 }
  0xba   : > { %3531 = vmatpush3.bf16.msra.mxu0 %v3920_v3 }
  0xbb   : > { %3532 = vmatprep.subr.bf16.mxu0 %v3921_v4 }
  0xbe   : > { %3533 = vmatpush3.bf16.msra.mxu0 %v3921_v4 }
  0xbf   : > { %3534 = vmatprep.subr.bf16.mxu0 %v3922_v5 }
  0xc2   : > { %3535 = vmatpush3.bf16.msra.mxu0 %v3922_v5 }
  0xc3   : > { %3536 = vmatprep.subr.bf16.mxu0 %v3923_v6 }
  0xc6   : > { %3537 = vmatpush3.bf16.msra.mxu0 %v3923_v6 }
  0xc7   : > { %3566 = vmatprep.subr.bf16.mxu0 %v4251_v7 }
  0xc9   : > { %3539 = vmatmul.mubr.bf16.vlgmr.msra.gmra.mrb[8].mxu0 %v393_v43 }
  0xca   : > { %3542 = vmatprep.mubr.bf16.mxu0 %v394_v45 }
  0xd1   : > { %3543 = vmatmul.mubr.bf16.gmra.mrb[12].mxu0 %v395_v57 }
  0xd2   : > { %3546 = vmatprep.mubr.bf16.mxu0 %v396_v60 }
  0xd9   : > { %3547 = vmatmul.mubr.bf16.gmra.mrb[16].mxu0 %v397_v2 }
  0xda   : > { %3570 = vmatprep.mubr.msk.bf16.mxu0 %vm4252_vm0, %v4251_v7 }
 0x10e   : > { %v846_v9 = vpop.permute.xlu1 %845 }
 0x10f   : > { %v836_v8 = vpop.permute.xlu0 %835 }
 0x112   : > { %v851_v11 = vpop.permute.xlu1 %850 }
 0x113   : > { %v841_v10 = vpop.permute.xlu0 %840 }
 0x116   : > { %v861_v21 = vpop.permute.xlu1 %860 }
 0x117   : > { %v856_v15 = vpop.permute.xlu0 %855 }
 0x11a   : > { %v871_v36 = vpop.permute.xlu1 %870 }
 0x11b   : > { %v866_v32 = vpop.permute.xlu0 %865 }
 0x17b   : > { %v3512_v12 = vpop.f32.mrb[0].mxu1  ;;  %v3488_v17 = vpop.f32.mrb[0].mxu0 }
 0x17c   : > { %v625_v13 = vpop.f32.mrb[1].mxu1  ;;  %v875_v19 = vmul.f32 %v3488_v17, %v846_v9  ;;  %v496_v20 = vpop.f32.mrb[1].mxu0  ;;  %v4572_v33 = vpack.c.bf16 %v3512_v12, %v3512_v12 }
 0x17d   : > { %v3513_v14 = vpop.f32.mrb[2].mxu1  ;;  %v873_v22 = vmul.f32 %v836_v8, %v496_v20  ;;  %v3489_v23 = vpop.f32.mrb[2].mxu0 }
 0x17e   : > { %v628_v16 = vpop.f32.mrb[3].mxu1  ;;  %v876_v25 = vmul.f32 %v3489_v23, %v851_v11  ;;  %v499_v26 = vpop.f32.mrb[3].mxu0  ;;  %v909_v45 = vsel %vm901_vm1, %v4572_v33, 0 }
 0x17f   : > { %v4563_v18 = vpack.c.bf16 %v628_v16, %v625_v13  ;;  %v874_v27 = vmul.f32 %v841_v10, %v499_v26 }
 0x180   : > { %v4568_v29 = vpack.c.bf16 %v876_v25, %v875_v19 }
 0x181   : > { %v906_v24 = vsel %vm901_vm1, %v4563_v18, 0  ;;  %v4570_v31 = vpack.c.bf16 %v874_v27, %v873_v22 }
 0x182   : > { %3551 = vmatpush3.bf16.xpose.msra.mxu1 %v906_v24 }
 0x183   : > { %v3516_v28 = vpop.f32.mrb[4].mxu1  ;;  %3552 = vmatprep.subr.bf16.mxu1 %v4251_v7  ;;  %v3492_v39 = vpop.f32.mrb[4].mxu0 }
 0x184   : > { %v641_v30 = vpop.f32.mrb[5].mxu1  ;;  %v512_v40 = vpop.f32.mrb[5].mxu0  ;;  %v879_v41 = vmul.f32 %v3492_v39, %v866_v32 }
 0x185   : > { %v4574_v34 = vpack.c.bf16 %v641_v30, %v3513_v14  ;;  %v3517_v35 = vpop.f32.mrb[6].mxu1  ;;  %v877_v43 = vmul.f32 %v856_v15, %v512_v40  ;;  %v3493_v44 = vpop.f32.mrb[6].mxu0 }
 0x186   : > { %v4576_v37 = vpack.c.bf16 %v3517_v35, %v3516_v28  ;;  %v644_v38 = vpop.f32.mrb[7].mxu1  ;;  %v880_v46 = vmul.f32 %v3493_v44, %v871_v36  ;;  %v515_v47 = vpop.f32.mrb[7].mxu0 }
 0x187   : > { %v878_v48 = vmul.f32 %v861_v21, %v515_v47  ;;  %v956_v58 = vsel %vm901_vm1, %v4574_v34, 0  ;;  %v4602_v59 = vpack.c.bf16 %v644_v38, %v644_v38 }
 0x188   : > { %v1006_v42 = vsel %vm901_vm1, %v4576_v37, 0  ;;  %v4583_v50 = vpack.c.bf16 %v880_v46, %v879_v41 }
 0x189   : > { %3567 = vmatpush3.bf16.xpose.msra.mxu0 %v1006_v42  ;;  %v4586_v52 = vpack.c.bf16 %v878_v48, %v877_v43  ;;  %v959_v60 = vsel %vm901_vm1, %v4602_v59, 0 }
 0x18a   : > { %3553 = vmatpush3.bf16.xpose.msra.mxu1 %v909_v45  ;;  %3568 = vmatprep.subr.bf16.mxu0 %v4251_v7 }
 0x18b   : > { %v3520_v49 = vpop.f32.mrb[8].mxu1  ;;  %3558 = vmatprep.subr.bf16.mxu1 %v4251_v7 }
 0x18c   : > { %v657_v51 = vpop.f32.mrb[9].mxu1 }
 0x18d   : > { %v4588_v53 = vpack.c.bf16 %v657_v51, %v657_v51  ;;  %v3521_v54 = vpop.f32.mrb[10].mxu1 }
 0x18e   : > { %v660_v55 = vpop.f32.mrb[11].mxu1  ;;  %v4618_v62 = vpack.c.bf16 %v3521_v54, %v3521_v54 }
 0x18f   : > { %v1009_v56 = vsel %vm901_vm1, %v4588_v53, 0  ;;  %v4592_v57 = vpack.c.bf16 %v3520_v49, %v660_v55 }
 0x190   : > { %v1059_v63 = vsel %vm901_vm1, %v4618_v62, 0 }
 0x191   : > { %3555 = vmatmul.mubr.msk.bf16.vlgmr.msra.gmra.mrb[12].mxu1 %vm901_vm1, %v4570_v31  ;;  %3569 = vmatpush3.bf16.xpose.msra.mxu0 %v1009_v56  ;;  %v1056_v61 = vsel %vm901_vm1, %v4592_v57, 0 }
 0x192   : > { %3559 = vmatpush3.bf16.xpose.msra.mxu1 %v956_v58  ;;  %3562 = vmatprep.mubr.msk.bf16.mxu1 %vm4252_vm0, %v4251_v7 }
 0x193   : > { %3560 = vmatprep.subr.bf16.mxu1 %v4251_v7  ;;  %3582 = vmatprep.subr.bf16.mxu0 %v4251_v7 }
 0x198   : > { %3571 = vmatmul.mubr.msk.bf16.vlgmr.msra.gmra.mrb[20].mxu0 %vm901_vm1, %v4586_v52 }
 0x199   : > { %3586 = vmatprep.mubr.msk.bf16.mxu0 %vm4252_vm0, %v4251_v7 }
 0x19a   : > { %3561 = vmatpush3.bf16.xpose.msra.mxu1 %v959_v60 }
 0x19b   : > { %3574 = vmatprep.subr.bf16.mxu1 %v4251_v7 }
 0x19c   : > { %v3540_v0 = vpop.f32.mrb[8].mxu0 }
 0x19d   : > { %v770_v1 = vpop.f32.mrb[9].mxu0  ;;  %v4633_v9 = vpack.c.bf16 %v3540_v0, %v3540_v0 }
 0x19e   : > { %v3541_v2 = vpop.f32.mrb[10].mxu0 }
 0x19f   : > { %v773_v3 = vpop.f32.mrb[11].mxu0  ;;  %v1200_v10 = vsel %vm1198_vm2, %v4633_v9, 0 }
 0x1a0   : > { %v4627_v4 = vpack.c.bf16 %v773_v3, %v770_v1 }
 0x1a1   : > { %3563 = vmatmul.mubr.msk.bf16.vlgmr.msra.gmra.mrb[16].mxu1 %vm901_vm1, %v4568_v29 }
 0x1a2   : > { %3575 = vmatpush3.bf16.xpose.msra.mxu1 %v1056_v61  ;;  %3578 = vmatprep.mubr.msk.bf16.mxu1 %vm4252_vm0, %v4251_v7 }
 0x1a3   : > { %3576 = vmatprep.subr.bf16.mxu1 %v4251_v7  ;;  %3583 = vmatpush3.bf16.msra.mxu0 %v4627_v4 }
 0x1a4   : > { %3584 = vmatprep.subr.bf16.mxu0 %v4251_v7  ;;  %v3544_v5 = vpop.f32.mrb[12].mxu0 }
 0x1a5   : > { %v786_v6 = vpop.f32.mrb[13].mxu0 }
 0x1a6   : > { %v4631_v8 = vpack.c.bf16 %v786_v6, %v3541_v2  ;;  %v3545_v11 = vpop.f32.mrb[14].mxu0 }
 0x1a7   : > { %3585 = vmatpush3.bf16.msra.mxu0 %v1200_v10  ;;  %v4639_v12 = vpack.c.bf16 %v3545_v11, %v3544_v5  ;;  %v789_v13 = vpop.f32.mrb[15].mxu0 }
 0x1a8   : > { %3598 = vmatprep.subr.bf16.mxu0 %v4251_v7  ;;  %v4642_v14 = vpack.c.bf16 %v789_v13, %v789_v13 }
 0x1aa   : > { %3577 = vmatpush3.bf16.xpose.msra.mxu1 %v1059_v63  ;;  %v1247_v21 = vsel %vm1198_vm2, %v4642_v14, 0 }
 0x1ab   : > { %3590 = vmatprep.subr.bf16.mxu1 %v4251_v7 }
 0x1ac   : > { %v3548_v15 = vpop.f32.mrb[16].mxu0 }
 0x1ad   : > { %v4644_v16 = vpop.f32.mrb[17].mxu0 }
 0x1ae   : > { %v4646_v17 = vpop.f32.mrb[18].mxu0 }
 0x1af   : > { %v805_v19 = vpop.f32.mrb[19].mxu0 }
 0x1b0   : > { %v4648_v20 = vpack.c.bf16 %v3548_v15, %v805_v19 }
 0x1b1   : > { %3579 = vmatmul.mubr.msk.bf16.vlgmr.msra.gmra.mrb[20].mxu1 %vm901_vm1, %v4583_v50 }
 0x1b2   : > { %3594 = vmatprep.mubr.msk.bf16.mxu1 %vm4252_vm0, %v4251_v7  ;;  %3591 = vmatpush3.bf16.msra.mxu1 %v4631_v8 }
 0x1b3   : > { %3592 = vmatprep.subr.bf16.mxu1 %v4251_v7 }
 0x1b6   : > { %3593 = vmatpush3.bf16.msra.mxu1 %v1247_v21 }
 0x1b7   : > { %3606 = vmatprep.subr.bf16.mxu1 %v4251_v7 }
 0x264   : > { %v945_v22 = vpop.f32.mrb[12].mxu1 }
 0x265   : > { %v3556_v23 = vpop.f32.mrb[13].mxu1  ;;  %v1103_v24 = vsel %vm1102_vm3, %v945_v22, -inf }
 0x266   : > { %1104 = vmax.xlane.f32.xlu0 %v1103_v24  ;;  %v948_v25 = vpop.f32.mrb[14].mxu1 }
 0x267   : > { %v1106_v26 = vsel %vm1102_vm3, %v948_v25, -inf  ;;  %v3557_v27 = vpop.f32.mrb[15].mxu1 }
 0x268   : > { %1107 = vmax.xlane.f32.xlu1 %v1106_v26 }
 0x26b   : > { %v1045_v28 = vpop.f32.mrb[20].mxu0 }
 0x26c   : > { %v3572_v30 = vpop.f32.mrb[21].mxu0  ;;  %v1115_v32 = vsel %vm1102_vm3, %v1045_v28, -inf }
 0x26d   : > { %1116 = vmax.xlane.f32.xlu1 %v1115_v32  ;;  %v1048_v35 = vpop.f32.mrb[22].mxu0 }
 0x26e   : > { %v3573_v36 = vpop.f32.mrb[23].mxu0  ;;  %v1118_v44 = vsel %vm1102_vm3, %v1048_v35, -inf }
 0x274   : > { %v995_v38 = vpop.f32.mrb[16].mxu1 }
 0x275   : > { %v3564_v39 = vpop.f32.mrb[17].mxu1  ;;  %v1109_v40 = vsel %vm1102_vm3, %v995_v38, -inf }
 0x276   : > { %1110 = vmax.xlane.f32.xlu0 %v1109_v40  ;;  %v998_v41 = vpop.f32.mrb[18].mxu1 }
 0x277   : > { %v3565_v42 = vpop.f32.mrb[19].mxu1  ;;  %v1112_v43 = vsel %vm1102_vm3, %v998_v41, -inf }
 0x27a   : > { %1113 = vmax.xlane.f32.xlu0 %v1112_v43 }
 0x27e   : > { %1119 = vmax.xlane.f32.xlu0 %v1118_v44 }
 0x284   : > { %v1095_v45 = vpop.f32.mrb[20].mxu1 }
 0x285   : > { %v3580_v46 = vpop.f32.mrb[21].mxu1  ;;  %v1121_v47 = vsel %vm1102_vm3, %v1095_v45, -inf }
 0x286   : > { %v1098_v48 = vpop.f32.mrb[22].mxu1  ;;  %1122 = vmax.xlane.f32.xlu1 %v1121_v47 }
 0x287   : > { %v3581_v49 = vpop.f32.mrb[23].mxu1  ;;  %v1124_v51 = vsel %vm1102_vm3, %v1098_v48, -inf }
 0x288   : > { %1125 = vmax.xlane.f32.xlu0 %v1124_v51 }
 0x2f3   : > { %v1105_v54 = vpop.xlane.xlu0 %1104 }
 0x2f4   : > { %v1127_v55 = vsub.f32 %v945_v22, %v1105_v54 }
 0x2f5   : > { %v1108_v56 = vpop.xlane.xlu1 %1107 }
 0x2f6   : > { %v1135_v58 = vmul.f32 1.442695, %v1127_v55  ;;  %v1128_v60 = vsub.f32 %v948_v25, %v1108_v56 }
 0x2f8   : > { %3924 = vpow2.f32 %v1135_v58  ;;  %v1137_v61 = vmul.f32 1.442695, %v1128_v60 }
 0x2fa   : > { %3926 = vpow2.f32 %v1137_v61  ;;  %v1117_v63 = vpop.xlane.xlu1 %1116  ;;  %v4729_v61 = vpack.c.bf16 %v4644_v16, %v4644_v16 }
 0x2fb   : > { %v1131_v1 = vsub.f32 %v1045_v28, %v1117_v63 }
 0x2fd   : > { %v1143_v11 = vmul.f32 1.442695, %v1131_v1 }
 0x302   : > { %v4661_v0 = vpop.eup %3924 }
 0x303   : > { %v1111_v2 = vpop.xlane.xlu0 %1110  ;;  %v1151_v3 = vsel %vm1102_vm3, %v4661_v0, 0.0 }
 0x304   : > { %v4665_v5 = vpop.eup %3926  ;;  %v1129_v6 = vsub.f32 %v995_v38, %v1111_v2  ;;  %1152 = vadd.xlane.f32.xlu1 %v1151_v3 }
 0x305   : > { %v1154_v10 = vsel %vm1102_vm3, %v4665_v5, 0.0 }
 0x306   : > { %v1139_v13 = vmul.f32 1.442695, %v1129_v6  ;;  %1155 = vadd.xlane.f32.xlu0 %v1154_v10 }
 0x307   : > { %v1114_v15 = vpop.xlane.xlu0 %1113 }
 0x308   : > { %3928 = vpow2.f32 %v1139_v13  ;;  %v1130_v19 = vsub.f32 %v998_v41, %v1114_v15 }
 0x309   : > { %3930 = vpow2.f32 %v1143_v11 }
 0x30a   : > { %v1141_v21 = vmul.f32 1.442695, %v1130_v19 }
 0x30b   : > { %v1120_v22 = vpop.xlane.xlu0 %1119 }
 0x30c   : > { %3932 = vpow2.f32 %v1141_v21  ;;  %v1132_v23 = vsub.f32 %v1048_v35, %v1120_v22  ;;  %v4745_v21 = vpack.c.bf16 %v4646_v17, %v4646_v17 }
 0x30e   : > { %v1145_v24 = vmul.f32 1.442695, %v1132_v23 }
 0x310   : > { %3934 = vpow2.f32 %v1145_v24 }
 0x312   : > { %v4669_v25 = vpop.eup %3928 }
 0x313   : > { %v1157_v26 = vsel %vm1102_vm3, %v4669_v25, 0.0  ;;  %v4673_v27 = vpop.eup %3930  ;;  %v1123_v43 = vpop.xlane.xlu1 %1122 }
 0x314   : > { %1158 = vadd.xlane.f32.xlu1 %v1157_v26  ;;  %v1163_v36 = vsel %vm1102_vm3, %v4673_v27, 0.0  ;;  %v1133_v44 = vsub.f32 %v1095_v45, %v1123_v43 }
 0x315   : > { %v1126_v28 = vpop.xlane.xlu0 %1125 }
 0x316   : > { %v4675_v30 = vpop.eup %3932  ;;  %v1134_v32 = vsub.f32 %v1098_v48, %v1126_v28  ;;  %v1147_v46 = vmul.f32 1.442695, %v1133_v44 }
 0x317   : > { %v1160_v35 = vsel %vm1102_vm3, %v4675_v30, 0.0 }
 0x318   : > { %v1149_v38 = vmul.f32 1.442695, %v1134_v32  ;;  %1164 = vadd.xlane.f32.xlu1 %v1163_v36  ;;  %1161 = vadd.xlane.f32.xlu0 %v1160_v35 }
 0x31a   : > { %v4681_v39 = vpop.eup %3934  ;;  %3936 = vpow2.f32 %v1149_v38 }
 0x31b   : > { %v1166_v40 = vsel %vm1102_vm3, %v4681_v39, 0.0  ;;  %3938 = vpow2.f32 %v1147_v46 }
 0x31c   : > { %1167 = vadd.xlane.f32.xlu0 %v1166_v40 }
 0x324   : > { %v4685_v41 = vpop.eup %3936 }
 0x325   : > { %v1172_v42 = vsel %vm1102_vm3, %v4685_v41, 0.0  ;;  %v4699_v47 = vpop.eup %3938 }
 0x326   : > { %1173 = vadd.xlane.f32.xlu0 %v1172_v42  ;;  %v1169_v45 = vsel %vm1102_vm3, %v4699_v47, 0.0 }
 0x329   : > { %1397 = vrot.lane.b32.xlu1 %v4563_v18, %s4253_s8 }
 0x33c   : > { %1456 = vrot.lane.b32.xlu0 %v4574_v34, %s4253_s8 }
 0x340   : > { %1515 = vrot.lane.b32.xlu0 %v4576_v37, %s4253_s8 }
 0x344   : > { %1393 = vrot.lane.b32.xlu0 %v4570_v31, %s4253_s8 }
 0x348   : > { %1517 = vrot.lane.b32.xlu0 %v4588_v53, %s4253_s8 }
 0x34c   : > { %1511 = vrot.lane.b32.xlu0 %v4586_v52, %s4253_s8 }
 0x34d   : > { %1170 = vadd.xlane.f32.xlu1 %v1169_v45 }
 0x350   : > { %1776 = vrot.lane.b32.xlu0 %v4631_v8, %s4253_s8 }
 0x35e   : > { %1399 = vrot.lane.b32.xlu1 %v4572_v33, %s4253_s8 }
 0x362   : > { %1458 = vrot.lane.b32.xlu1 %v4602_v59, %s4253_s8 }
 0x366   : > { %1574 = vrot.lane.b32.xlu1 %v4592_v57, %s4253_s8 }
 0x36a   : > { %1452 = vrot.lane.b32.xlu1 %v4568_v29, %s4253_s8 }
 0x36e   : > { %1576 = vrot.lane.b32.xlu1 %v4618_v62, %s4253_s8 }
 0x372   : > { %1570 = vrot.lane.b32.xlu1 %v4583_v50, %s4253_s8 }
 0x376   : > { %1722 = vrot.lane.b32.xlu1 %v4627_v4, %s4253_s8 }
 0x37a   : > { %1724 = vrot.lane.b32.xlu1 %v4633_v9, %s4253_s8 }
 0x37e   : > { %1778 = vrot.lane.b32.xlu1 %v4642_v14, %s4253_s8 }
 0x391   : > { %v1153_v48 = vpop.xlane.xlu1 %1152 }
 0x392   : > { %3940 = vrcp.f32 %v1153_v48 }
 0x393   : > { %v1156_v49 = vpop.xlane.xlu0 %1155 }
 0x394   : > { %3942 = vrcp.f32 %v1156_v49 }
 0x39c   : > { %v3941_v51 = vpop.eup %3940 }
 0x39d   : > { %v1183_v55 = vmul.f32 %v3941_v51, %v4661_v0  ;;  %v1294_v0 = vsel %vm1198_vm2, %v4729_v61, 0 }
 0x39e   : > { %v3943_v54 = vpop.eup %3942 }
 0x39f   : > { %v1184_v56 = vmul.f32 %v3943_v54, %v4665_v5 }
 0x3a1   : > { %v1159_v58 = vpop.xlane.xlu1 %1158  ;;  %v1191_v60 = vpack.c.bf16 %v1184_v56, %v1183_v55 }
 0x3a2   : > { %3944 = vrcp.f32 %v1159_v58 }
 0x3a3   : > { %3587 = vmatmul.mubr.msk.bf16.vlgmr.msra.gmra.mrb[24].mxu0 %vm1102_vm3, %v1191_v60 }
 0x3a4   : > { %3599 = vmatpush3.bf16.msra.mxu0 %v4639_v12  ;;  %3602 = vmatprep.mubr.msk.bf16.mxu0 %vm4252_vm0, %v4251_v7 }
 0x3a5   : > { %v1165_v63 = vpop.xlane.xlu1 %1164  ;;  %v1162_v1 = vpop.xlane.xlu0 %1161  ;;  %3600 = vmatprep.subr.bf16.mxu0 %v4251_v7 }
 0x3a6   : > { %3946 = vrcp.f32 %v1162_v1 }
 0x3a7   : > { %3948 = vrcp.f32 %v1165_v63 }
 0x3a8   : > { %3601 = vmatpush3.bf16.msra.mxu0 %v1294_v0 }
 0x3a9   : > { %v1168_v16 = vpop.xlane.xlu0 %1167  ;;  %3614 = vmatprep.subr.bf16.mxu0 %v4251_v7  ;;  %v1398_v22 = vpop.permute.xlu1 %1397 }
 0x3aa   : > { %3950 = vrcp.f32 %v1168_v16  ;;  %v1405_v24 = vsel %vm901_vm1, %v1398_v22, 0 }
 0x3ac   : > { %v3945_v2 = vpop.eup %3944 }
 0x3ad   : > { %v1185_v6 = vmul.f32 %v3945_v2, %v4669_v25  ;;  %v1341_v25 = vsel %vm1198_vm2, %v4745_v21, 0 }
 0x3b0   : > { %v3947_v3 = vpop.eup %3946 }
 0x3b1   : > { %v3949_v5 = vpop.eup %3948  ;;  %v1186_v10 = vmul.f32 %v3947_v3, %v4675_v30 }
 0x3b2   : > { %v1187_v15 = vmul.f32 %v3949_v5, %v4673_v27 }
 0x3b3   : > { %v1192_v13 = vpack.c.bf16 %v1186_v10, %v1185_v6  ;;  %v1174_v17 = vpop.xlane.xlu0 %1173 }
 0x3b4   : > { %v3951_v11 = vpop.eup %3950  ;;  %3952 = vrcp.f32 %v1174_v17 }
 0x3b5   : > { %v1188_v19 = vmul.f32 %v3951_v11, %v4681_v39  ;;  %3595 = vmatmul.mubr.msk.bf16.vlgmr.msra.gmra.mrb[24].mxu1 %vm1102_vm3, %v1192_v13 }
 0x3b6   : > { %3607 = vmatpush3.bf16.msra.mxu1 %v4648_v20  ;;  %3610 = vmatprep.mubr.msk.bf16.mxu1 %vm4252_vm0, %v4251_v7 }
 0x3b7   : > { %v1193_v23 = vpack.c.bf16 %v1188_v19, %v1187_v15  ;;  %3608 = vmatprep.subr.bf16.mxu1 %v4251_v7  ;;  %v1457_v26 = vpop.permute.xlu0 %1456 }
 0x3b8   : > { %v1464_v45 = vsel %vm901_vm1, %v1457_v26, 0 }
 0x3b9   : > { %3603 = vmatmul.mubr.msk.bf16.vlgmr.msra.gmra.mrb[28].mxu0 %vm1102_vm3, %v1193_v23 }
 0x3ba   : > { %3615 = vmatpush3.bf16.xpose.msra.mxu0 %v1405_v24  ;;  %3618 = vmatprep.mubr.msk.bf16.mxu0 %vm4252_vm0, %v4251_v7 }
 0x3bb   : > { %3609 = vmatpush3.bf16.msra.mxu1 %v1341_v25  ;;  %3616 = vmatprep.subr.bf16.mxu0 %v4251_v7  ;;  %v1516_v32 = vpop.permute.xlu0 %1515 }
 0x3bc   : > { %3622 = vmatprep.subr.bf16.mxu1 %v4251_v7  ;;  %v1523_v44 = vsel %vm901_vm1, %v1516_v32, 0 }
 0x3be   : > { %v3953_v35 = vpop.eup %3952 }
 0x3bf   : > { %v1190_v39 = vmul.f32 %v3953_v35, %v4685_v41  ;;  %v1394_v40 = vpop.permute.xlu0 %1393 }
 0x3c3   : > { %v1518_v41 = vpop.permute.xlu0 %1517 }
 0x3c4   : > { %v1526_v49 = vsel %vm901_vm1, %v1518_v41, 0 }
 0x3c7   : > { %v1512_v55 = vpop.permute.xlu0 %1511 }
 0x3cb   : > { %v1777_v0 = vpop.permute.xlu0 %1776 }
 0x3da   : > { %v1171_v27 = vpop.xlane.xlu1 %1170 }
 0x3db   : > { %3954 = vrcp.f32 %v1171_v27 }
 0x3de   : > { %v1400_v28 = vpop.permute.xlu1 %1399 }
 0x3df   : > { %v1408_v30 = vsel %vm901_vm1, %v1400_v28, 0 }
 0x3e0   : > { %3617 = vmatpush3.bf16.xpose.msra.mxu0 %v1408_v30 }
 0x3e1   : > { %3630 = vmatprep.subr.bf16.mxu0 %v4251_v7 }
 0x3e2   : > { %v1459_v36 = vpop.permute.xlu1 %1458 }
 0x3e3   : > { %v1467_v51 = vsel %vm901_vm1, %v1459_v36, 0 }
 0x3e5   : > { %v3955_v38 = vpop.eup %3954 }
 0x3e6   : > { %v1189_v42 = vmul.f32 %v3955_v38, %v4699_v47  ;;  %v1575_v43 = vpop.permute.xlu1 %1574 }
 0x3e7   : > { %3619 = vmatmul.mubr.msk.bf16.vlgmr.msra.gmra.mrb[32].mxu0 %vm901_vm1, %v1394_v40  ;;  %v1582_v58 = vsel %vm901_vm1, %v1575_v43, 0 }
 0x3e8   : > { %3631 = vmatpush3.bf16.xpose.msra.mxu0 %v1523_v44  ;;  %v1194_v46 = vpack.c.bf16 %v1190_v39, %v1189_v42  ;;  %3634 = vmatprep.mubr.msk.bf16.mxu0 %vm4252_vm0, %v4251_v7 }
 0x3e9   : > { %3632 = vmatprep.subr.bf16.mxu0 %v4251_v7 }
 0x3ea   : > { %v1453_v48 = vpop.permute.xlu1 %1452  ;;  %3611 = vmatmul.mubr.msk.bf16.vlgmr.msra.gmra.mrb[28].mxu1 %vm1102_vm3, %v1194_v46 }
 0x3eb   : > { %3623 = vmatpush3.bf16.xpose.msra.mxu1 %v1464_v45  ;;  %3626 = vmatprep.mubr.msk.bf16.mxu1 %vm4252_vm0, %v4251_v7 }
 0x3ec   : > { %3624 = vmatprep.subr.bf16.mxu1 %v4251_v7 }
 0x3ee   : > { %v1577_v47 = vpop.permute.xlu1 %1576 }
 0x3ef   : > { %v1585_v1 = vsel %vm901_vm1, %v1577_v47, 0 }
 0x3f0   : > { %3633 = vmatpush3.bf16.xpose.msra.mxu0 %v1526_v49 }
 0x3f1   : > { %3646 = vmatprep.subr.bf16.mxu0 %v4251_v7 }
 0x3f2   : > { %v1571_v54 = vpop.permute.xlu1 %1570 }
 0x3f3   : > { %3625 = vmatpush3.bf16.xpose.msra.mxu1 %v1467_v51 }
 0x3f4   : > { %3638 = vmatprep.subr.bf16.mxu1 %v4251_v7 }
 0x3f6   : > { %v1723_v56 = vpop.permute.xlu1 %1722 }
 0x3f7   : > { %3635 = vmatmul.mubr.msk.bf16.vlgmr.msra.gmra.mrb[36].mxu0 %vm901_vm1, %v1512_v55 }
 0x3f8   : > { %3647 = vmatpush3.bf16.msra.mxu0 %v1723_v56  ;;  %3650 = vmatprep.mubr.msk.bf16.mxu0 %vm4252_vm0, %v4251_v7 }
 0x3f9   : > { %3648 = vmatprep.subr.bf16.mxu0 %v4251_v7 }
 0x3fa   : > { %3627 = vmatmul.mubr.msk.bf16.vlgmr.msra.gmra.mrb[32].mxu1 %vm901_vm1, %v1453_v48  ;;  %v1725_v60 = vpop.permute.xlu1 %1724 }
 0x3fb   : > { %v1731_v63 = vsel %vm1198_vm2, %v1725_v60, 0  ;;  %3639 = vmatpush3.bf16.xpose.msra.mxu1 %v1582_v58  ;;  %3642 = vmatprep.mubr.msk.bf16.mxu1 %vm4252_vm0, %v4251_v7 }
 0x3fc   : > { %3649 = vmatpush3.bf16.msra.mxu0 %v1731_v63  ;;  %3640 = vmatprep.subr.bf16.mxu1 %v4251_v7 }
 0x3fd   : > { %3662 = vmatprep.subr.bf16.mxu0 %v4251_v7 }
 0x3fe   : > { %v1779_v16 = vpop.permute.xlu1 %1778 }
 0x3ff   : > { %v1785_v2 = vsel %vm1198_vm2, %v1779_v16, 0 }
 0x403   : > { %3641 = vmatpush3.bf16.xpose.msra.mxu1 %v1585_v1 }
 0x404   : > { %3654 = vmatprep.subr.bf16.mxu1 %v4251_v7 }
 0x40a   : > { %3643 = vmatmul.mubr.msk.bf16.vlgmr.msra.gmra.mrb[36].mxu1 %vm901_vm1, %v1571_v54 }
 0x40b   : > { %3655 = vmatpush3.bf16.msra.mxu1 %v1777_v0  ;;  %3658 = vmatprep.mubr.msk.bf16.mxu1 %vm4252_vm0, %v4251_v7 }
 0x40c   : > { %3656 = vmatprep.subr.bf16.mxu1 %v4251_v7 }
 0x40f   : > { %3657 = vmatpush3.bf16.msra.mxu1 %v1785_v2 }
 0x410   : > { %3670 = vmatprep.subr.bf16.mxu1 %v4251_v7 }
 0x476   : > { %v1236_v3 = vpop.f32.mrb[24].mxu0 }
 0x477   : > { %1384 = vst.msk [vmem:[%s4798_s13] sm:$0xff] %vm901_vm1, %v1236_v3  ;;  %v3588_v5 = vpop.f32.mrb[25].mxu0 }
 0x478   : > { %v1239_v6 = vpop.f32.mrb[26].mxu0 }
 0x479   : > { %1385 = vst.msk [vmem:[%s4798_s13 + $0x8] sm:$0xff] %vm901_vm1, %v1239_v6  ;;  %v3589_v10 = vpop.f32.mrb[27].mxu0 }
 0x488   : > { %v1283_v11 = vpop.f32.mrb[24].mxu1 }
 0x489   : > { %1386 = vst.msk [vmem:[%s4798_s13 + $0x10] sm:$0xff] %vm901_vm1, %v1283_v11  ;;  %v3596_v13 = vpop.f32.mrb[25].mxu1 }
 0x48a   : > { %v1286_v15 = vpop.f32.mrb[26].mxu1 }
 0x48b   : > { %1387 = vst.msk [vmem:[%s4798_s13 + $0x18] sm:$0xff] %vm901_vm1, %v1286_v15  ;;  %v3597_v19 = vpop.f32.mrb[27].mxu1 }
 0x48c   : > { %v1330_v22 = vpop.f32.mrb[28].mxu0 }
 0x48d   : > { %1388 = vst.msk [vmem:[%s4798_s13 + $0x20] sm:$0xff] %vm901_vm1, %v1330_v22  ;;  %v3604_v23 = vpop.f32.mrb[29].mxu0 }
 0x48e   : > { %v1333_v24 = vpop.f32.mrb[30].mxu0 }
 0x48f   : > { %1389 = vst.msk [vmem:[%s4798_s13 + $0x28] sm:$0xff] %vm901_vm1, %v1333_v24  ;;  %v3605_v25 = vpop.f32.mrb[31].mxu0 }
 0x4ba   : > { %v1444_v17 = vpop.f32.mrb[32].mxu0 }
 0x4bb   : > { %v3620_v26 = vpop.f32.mrb[33].mxu0  ;;  %v1628_v27 = vsel %vm1102_vm3, %v1444_v17, -inf }
 0x4bc   : > { %1629 = vmax.xlane.f32.xlu0 %v1628_v27  ;;  %v1447_v28 = vpop.f32.mrb[34].mxu0 }
 0x4bd   : > { %v1377_v30 = vpop.f32.mrb[28].mxu1  ;;  %v3621_v32 = vpop.f32.mrb[35].mxu0  ;;  %v1631_v36 = vsel %vm1102_vm3, %v1447_v28, -inf }
 0x4be   : > { %1390 = vst.msk [vmem:[%s4798_s13 + $0x30] sm:$0xff] %vm901_vm1, %v1377_v30  ;;  %1632 = vmax.xlane.f32.xlu1 %v1631_v36  ;;  %v3612_v35 = vpop.f32.mrb[29].mxu1 }
 0x4bf   : > { %v1380_v38 = vpop.f32.mrb[30].mxu1 }
 0x4c0   : > { %1391 = vst.msk [vmem:[%s4798_s13 + $0x38] sm:$0xff] %vm901_vm1, %v1380_v38  ;;  %v3613_v39 = vpop.f32.mrb[31].mxu1 }
 0x4ca   : > { %v1562_v40 = vpop.f32.mrb[36].mxu0 }
 0x4cb   : > { %v3636_v42 = vpop.f32.mrb[37].mxu0  ;;  %v1640_v43 = vsel %vm1102_vm3, %v1562_v40, -inf }
 0x4cc   : > { %1641 = vmax.xlane.f32.xlu1 %v1640_v43  ;;  %v1565_v44 = vpop.f32.mrb[38].mxu0 }
 0x4cd   : > { %v1503_v46 = vpop.f32.mrb[32].mxu1  ;;  %v3637_v45 = vpop.f32.mrb[39].mxu0  ;;  %v1643_v48 = vsel %vm1102_vm3, %v1565_v44, -inf }
 0x4ce   : > { %v3628_v41 = vpop.f32.mrb[33].mxu1  ;;  %1644 = vmax.xlane.f32.xlu0 %v1643_v48  ;;  %v1634_v51 = vsel %vm1102_vm3, %v1503_v46, -inf }
 0x4cf   : > { %v1506_v47 = vpop.f32.mrb[34].mxu1 }
 0x4d0   : > { %v3629_v49 = vpop.f32.mrb[35].mxu1  ;;  %v1637_v54 = vsel %vm1102_vm3, %v1506_v47, -inf }
 0x4d2   : > { %1635 = vmax.xlane.f32.xlu0 %v1634_v51 }
 0x4d6   : > { %1638 = vmax.xlane.f32.xlu0 %v1637_v54 }
 0x4dd   : > { %v1621_v55 = vpop.f32.mrb[36].mxu1 }
 0x4de   : > { %v3644_v56 = vpop.f32.mrb[37].mxu1  ;;  %v1646_v58 = vsel %vm1102_vm3, %v1621_v55, -inf }
 0x4df   : > { %1647 = vmax.xlane.f32.xlu1 %v1646_v58  ;;  %v1624_v60 = vpop.f32.mrb[38].mxu1 }
 0x4e0   : > { %v3645_v63 = vpop.f32.mrb[39].mxu1  ;;  %v1649_v1 = vsel %vm1102_vm3, %v1624_v60, -inf }
 0x4e1   : > { %1650 = vmax.xlane.f32.xlu0 %v1649_v1 }
 0x4f0   : > { %1884 = vrot.lane.b32.xlu1 %v4648_v20, %s4253_s8 }
 0x4f7   : > { %1830 = vrot.lane.b32.xlu0 %v4639_v12, %s4253_s8 }
 0x549   : > { %v1630_v0 = vpop.xlane.xlu0 %1629 }
 0x54a   : > { %v1652_v16 = vsub.f32 %v1444_v17, %v1630_v0 }
 0x54b   : > { %v1633_v2 = vpop.xlane.xlu1 %1632 }
 0x54c   : > { %v1660_v3 = vmul.f32 1.442695, %v1652_v16  ;;  %v1653_v5 = vsub.f32 %v1447_v28, %v1633_v2 }
 0x54e   : > { %3956 = vpow2.f32 %v1660_v3  ;;  %v1662_v6 = vmul.f32 1.442695, %v1653_v5 }
 0x550   : > { %3958 = vpow2.f32 %v1662_v6 }
 0x558   : > { %v4828_v10 = vpop.eup %3956 }
 0x559   : > { %v1642_v11 = vpop.xlane.xlu1 %1641  ;;  %v1676_v13 = vsel %vm1102_vm3, %v4828_v10, 0.0 }
 0x55a   : > { %v4832_v15 = vpop.eup %3958  ;;  %v1656_v19 = vsub.f32 %v1562_v40, %v1642_v11  ;;  %1677 = vadd.xlane.f32.xlu1 %v1676_v13 }
 0x55b   : > { %v1645_v22 = vpop.xlane.xlu0 %1644  ;;  %v1679_v23 = vsel %vm1102_vm3, %v4832_v15, 0.0 }
 0x55c   : > { %v1668_v24 = vmul.f32 1.442695, %v1656_v19  ;;  %v1657_v25 = vsub.f32 %v1565_v44, %v1645_v22  ;;  %1680 = vadd.xlane.f32.xlu0 %v1679_v23 }
 0x55e   : > { %3960 = vpow2.f32 %v1668_v24  ;;  %v1670_v17 = vmul.f32 1.442695, %v1657_v25 }
 0x55f   : > { %v1636_v26 = vpop.xlane.xlu0 %1635 }
 0x560   : > { %3962 = vpow2.f32 %v1670_v17  ;;  %v1654_v27 = vsub.f32 %v1503_v46, %v1636_v26 }
 0x562   : > { %v1664_v28 = vmul.f32 1.442695, %v1654_v27 }
 0x563   : > { %v1639_v30 = vpop.xlane.xlu0 %1638 }
 0x564   : > { %3964 = vpow2.f32 %v1664_v28  ;;  %v1655_v32 = vsub.f32 %v1506_v47, %v1639_v30 }
 0x566   : > { %v1666_v36 = vmul.f32 1.442695, %v1655_v32 }
 0x568   : > { %v4836_v35 = vpop.eup %3960  ;;  %3966 = vpow2.f32 %v1666_v36 }
 0x569   : > { %v1688_v38 = vsel %vm1102_vm3, %v4836_v35, 0.0 }
 0x56a   : > { %v4840_v39 = vpop.eup %3962  ;;  %1689 = vadd.xlane.f32.xlu1 %v1688_v38 }
 0x56b   : > { %v1691_v40 = vsel %vm1102_vm3, %v4840_v39, 0.0 }
 0x56c   : > { %1692 = vadd.xlane.f32.xlu0 %v1691_v40  ;;  %v1648_v45 = vpop.xlane.xlu1 %1647 }
 0x56d   : > { %v1658_v48 = vsub.f32 %v1621_v55, %v1648_v45 }
 0x56e   : > { %v4844_v42 = vpop.eup %3964  ;;  %v1651_v41 = vpop.xlane.xlu0 %1650 }
 0x56f   : > { %v1682_v43 = vsel %vm1102_vm3, %v4844_v42, 0.0  ;;  %v1672_v47 = vmul.f32 1.442695, %v1658_v48  ;;  %v1659_v49 = vsub.f32 %v1624_v60, %v1651_v41 }
 0x570   : > { %1683 = vadd.xlane.f32.xlu1 %v1682_v43  ;;  %v1885_v55 = vpop.permute.xlu1 %1884 }
 0x571   : > { %3968 = vpow2.f32 %v1672_v47  ;;  %v1674_v51 = vmul.f32 1.442695, %v1659_v49 }
 0x572   : > { %v4848_v44 = vpop.eup %3966  ;;  %v1831_v60 = vpop.permute.xlu0 %1830 }
 0x573   : > { %v1685_v46 = vsel %vm1102_vm3, %v4848_v44, 0.0  ;;  %3970 = vpow2.f32 %v1674_v51 }
 0x574   : > { %1686 = vadd.xlane.f32.xlu0 %v1685_v46 }
 0x57b   : > { %v4856_v54 = vpop.eup %3968 }
 0x57c   : > { %v1694_v56 = vsel %vm1102_vm3, %v4856_v54, 0.0 }
 0x57d   : > { %v4860_v58 = vpop.eup %3970 }
 0x57e   : > { %v1697_v63 = vsel %vm1102_vm3, %v4860_v58, 0.0 }
 0x581   : > { %1886 = vrot.lane.b32.xlu1 %v4745_v21, %s4253_s8 }
 0x58a   : > { %1832 = vrot.lane.b32.xlu0 %v4729_v61, %s4253_s8 }
 0x5a5   : > { %1695 = vadd.xlane.f32.xlu1 %v1694_v56 }
 0x5a9   : > { %1698 = vadd.xlane.f32.xlu0 %v1697_v63 }
 0x5b6   : > { %2035 = vrot.lane.b32.xlu1 %v4574_v34, %s4254_s30 }
 0x5ba   : > { %2037 = vrot.lane.b32.xlu1 %v4602_v59, %s4254_s30 }
 0x5be   : > { %2147 = vrot.lane.b32.xlu1 %v4592_v57, %s4254_s30 }
 0x5bf   : > { %1979 = vrot.lane.b32.xlu0 %v4563_v18, %s4254_s30 }
 0x5c2   : > { %2033 = vrot.lane.b32.xlu1 %v4568_v29, %s4254_s30 }
 0x5c3   : > { %1981 = vrot.lane.b32.xlu0 %v4572_v33, %s4254_s30 }
 0x5c6   : > { %2149 = vrot.lane.b32.xlu1 %v4618_v62, %s4254_s30 }
 0x5c7   : > { %2091 = vrot.lane.b32.xlu0 %v4576_v37, %s4254_s30 }
 0x5ca   : > { %2145 = vrot.lane.b32.xlu1 %v4583_v50, %s4254_s30 }
 0x5cb   : > { %1977 = vrot.lane.b32.xlu0 %v4570_v31, %s4254_s30 }
 0x5ce   : > { %2293 = vrot.lane.b32.xlu1 %v4627_v4, %s4254_s30 }
 0x5cf   : > { %2093 = vrot.lane.b32.xlu0 %v4588_v53, %s4254_s30 }
 0x5d2   : > { %2295 = vrot.lane.b32.xlu1 %v4633_v9, %s4254_s30 }
 0x5d3   : > { %2089 = vrot.lane.b32.xlu0 %v4586_v52, %s4254_s30 }
 0x5d6   : > { %2347 = vrot.lane.b32.xlu1 %v4642_v14, %s4254_s30 }
 0x5d7   : > { %2345 = vrot.lane.b32.xlu0 %v4631_v8, %s4254_s30 }
 0x5e7   : > { %v1678_v1 = vpop.xlane.xlu1 %1677 }
 0x5e8   : > { %3972 = vrcp.f32 %v1678_v1 }
 0x5e9   : > { %v1681_v0 = vpop.xlane.xlu0 %1680 }
 0x5ea   : > { %3974 = vrcp.f32 %v1681_v0 }
 0x5f2   : > { %v3973_v16 = vpop.eup %3972 }
 0x5f3   : > { %v1708_v3 = vmul.f32 %v3973_v16, %v4828_v10 }
 0x5f4   : > { %v3975_v2 = vpop.eup %3974 }
 0x5f5   : > { %v1709_v5 = vmul.f32 %v3975_v2, %v4832_v15 }
 0x5f7   : > { %v1690_v6 = vpop.xlane.xlu1 %1689  ;;  %v1716_v11 = vpack.c.bf16 %v1709_v5, %v1708_v3 }
 0x5f8   : > { %3976 = vrcp.f32 %v1690_v6 }
 0x5f9   : > { %3651 = vmatmul.mubr.msk.bf16.vlgmr.msra.gmra.mrb[40].mxu0 %vm1102_vm3, %v1716_v11  ;;  %v1693_v13 = vpop.xlane.xlu0 %1692 }
 0x5fa   : > { %3663 = vmatpush3.bf16.msra.mxu0 %v1831_v60  ;;  %3978 = vrcp.f32 %v1693_v13  ;;  %3666 = vmatprep.mubr.msk.bf16.mxu0 %vm4252_vm0, %v4251_v7 }
 0x5fb   : > { %3664 = vmatprep.subr.bf16.mxu0 %v4251_v7 }
 0x5fd   : > { %v1684_v19 = vpop.xlane.xlu1 %1683 }
 0x5fe   : > { %3980 = vrcp.f32 %v1684_v19 }
 0x601   : > { %v1687_v22 = vpop.xlane.xlu0 %1686 }
 0x602   : > { %v3977_v23 = vpop.eup %3976  ;;  %3982 = vrcp.f32 %v1687_v22 }
 0x603   : > { %v1712_v15 = vmul.f32 %v3977_v23, %v4836_v35  ;;  %v1887_v35 = vpop.permute.xlu1 %1886 }
 0x604   : > { %v3979_v10 = vpop.eup %3978  ;;  %v1893_v38 = vsel %vm1198_vm2, %v1887_v35, 0 }
 0x605   : > { %v1713_v24 = vmul.f32 %v3979_v10, %v4840_v39  ;;  %v1833_v25 = vpop.permute.xlu0 %1832 }
 0x606   : > { %v1839_v17 = vsel %vm1198_vm2, %v1833_v25, 0 }
 0x607   : > { %3665 = vmatpush3.bf16.msra.mxu0 %v1839_v17  ;;  %v1718_v26 = vpack.c.bf16 %v1713_v24, %v1712_v15 }
 0x608   : > { %3678 = vmatprep.subr.bf16.mxu0 %v4251_v7  ;;  %v3981_v27 = vpop.eup %3980 }
 0x609   : > { %v1710_v30 = vmul.f32 %v3981_v27, %v4844_v42 }
 0x60a   : > { %3667 = vmatmul.mubr.msk.bf16.vlgmr.msra.gmra.mrb[44].mxu0 %vm1102_vm3, %v1718_v26 }
 0x60b   : > { %3682 = vmatprep.mubr.msk.bf16.mxu0 %vm4252_vm0, %v4251_v7 }
 0x60c   : > { %v3983_v28 = vpop.eup %3982 }
 0x60d   : > { %v1711_v32 = vmul.f32 %v3983_v28, %v4848_v44 }
 0x60f   : > { %v1717_v36 = vpack.c.bf16 %v1711_v32, %v1710_v30 }
 0x611   : > { %3659 = vmatmul.mubr.msk.bf16.vlgmr.msra.gmra.mrb[40].mxu1 %vm1102_vm3, %v1717_v36 }
 0x612   : > { %3671 = vmatpush3.bf16.msra.mxu1 %v1885_v55  ;;  %3674 = vmatprep.mubr.msk.bf16.mxu1 %vm4252_vm0, %v4251_v7 }
 0x613   : > { %3672 = vmatprep.subr.bf16.mxu1 %v4251_v7 }
 0x616   : > { %3673 = vmatpush3.bf16.msra.mxu1 %v1893_v38 }
 0x617   : > { %3686 = vmatprep.subr.bf16.mxu1 %v4251_v7 }
 0x632   : > { %v1696_v39 = vpop.xlane.xlu1 %1695 }
 0x633   : > { %3984 = vrcp.f32 %v1696_v39 }
 0x636   : > { %v2036_v40 = vpop.permute.xlu1 %2035  ;;  %v1699_v42 = vpop.xlane.xlu0 %1698 }
 0x637   : > { %3986 = vrcp.f32 %v1699_v42  ;;  %v2043_v1 = vsel %vm901_vm1, %v2036_v40, 0 }
 0x63a   : > { %v2038_v43 = vpop.permute.xlu1 %2037  ;;  %v1980_v44 = vpop.permute.xlu0 %1979 }
 0x63b   : > { %v1987_v46 = vsel %vm901_vm1, %v1980_v44, 0  ;;  %v2046_v16 = vsel %vm901_vm1, %v2038_v43, 0 }
 0x63c   : > { %3679 = vmatpush3.bf16.xpose.msra.mxu0 %v1987_v46 }
 0x63d   : > { %3680 = vmatprep.subr.bf16.mxu0 %v4251_v7  ;;  %v3985_v41 = vpop.eup %3984 }
 0x63e   : > { %v2148_v45 = vpop.permute.xlu1 %2147  ;;  %v1982_v48 = vpop.permute.xlu0 %1981  ;;  %v1714_v49 = vmul.f32 %v3985_v41, %v4856_v54 }
 0x63f   : > { %v1990_v56 = vsel %vm901_vm1, %v1982_v48, 0  ;;  %v2155_v6 = vsel %vm901_vm1, %v2148_v45, 0 }
 0x641   : > { %v3987_v47 = vpop.eup %3986 }
 0x642   : > { %v1715_v51 = vmul.f32 %v3987_v47, %v4860_v58  ;;  %v2034_v63 = vpop.permute.xlu1 %2033  ;;  %v2092_v55 = vpop.permute.xlu0 %2091 }
 0x643   : > { %v2099_v0 = vsel %vm901_vm1, %v2092_v55, 0 }
 0x644   : > { %3681 = vmatpush3.bf16.xpose.msra.mxu0 %v1990_v56  ;;  %v1719_v60 = vpack.c.bf16 %v1715_v51, %v1714_v49 }
 0x645   : > { %3694 = vmatprep.subr.bf16.mxu0 %v4251_v7 }
 0x646   : > { %3675 = vmatmul.mubr.msk.bf16.vlgmr.msra.gmra.mrb[44].mxu1 %vm1102_vm3, %v1719_v60  ;;  %v2150_v54 = vpop.permute.xlu1 %2149  ;;  %v1978_v58 = vpop.permute.xlu0 %1977 }
 0x647   : > { %3687 = vmatpush3.bf16.xpose.msra.mxu1 %v2043_v1  ;;  %3690 = vmatprep.mubr.msk.bf16.mxu1 %vm4252_vm0, %v4251_v7  ;;  %v2158_v22 = vsel %vm901_vm1, %v2150_v54, 0 }
 0x648   : > { %3688 = vmatprep.subr.bf16.mxu1 %v4251_v7 }
 0x64a   : > { %v2146_v2 = vpop.permute.xlu1 %2145  ;;  %v2094_v3 = vpop.permute.xlu0 %2093 }
 0x64b   : > { %3683 = vmatmul.mubr.msk.bf16.vlgmr.msra.gmra.mrb[48].mxu0 %vm901_vm1, %v1978_v58  ;;  %v2102_v5 = vsel %vm901_vm1, %v2094_v3, 0 }
 0x64c   : > { %3695 = vmatpush3.bf16.xpose.msra.mxu0 %v2099_v0  ;;  %3698 = vmatprep.mubr.msk.bf16.mxu0 %vm4252_vm0, %v4251_v7 }
 0x64d   : > { %3696 = vmatprep.subr.bf16.mxu0 %v4251_v7 }
 0x64e   : > { %v2294_v11 = vpop.permute.xlu1 %2293  ;;  %v2090_v13 = vpop.permute.xlu0 %2089 }
 0x64f   : > { %3689 = vmatpush3.bf16.xpose.msra.mxu1 %v2046_v16 }
 0x650   : > { %3702 = vmatprep.subr.bf16.mxu1 %v4251_v7 }
 0x652   : > { %v2296_v19 = vpop.permute.xlu1 %2295  ;;  %v2346_v10 = vpop.permute.xlu0 %2345 }
 0x653   : > { %v2302_v23 = vsel %vm1198_vm2, %v2296_v19, 0 }
 0x654   : > { %3697 = vmatpush3.bf16.xpose.msra.mxu0 %v2102_v5 }
 0x655   : > { %3710 = vmatprep.subr.bf16.mxu0 %v4251_v7 }
 0x656   : > { %3691 = vmatmul.mubr.msk.bf16.vlgmr.msra.gmra.mrb[48].mxu1 %vm901_vm1, %v2034_v63  ;;  %v2348_v15 = vpop.permute.xlu1 %2347 }
 0x657   : > { %3703 = vmatpush3.bf16.xpose.msra.mxu1 %v2155_v6  ;;  %3706 = vmatprep.mubr.msk.bf16.mxu1 %vm4252_vm0, %v4251_v7  ;;  %v2354_v24 = vsel %vm1198_vm2, %v2348_v15, 0 }
 0x658   : > { %3704 = vmatprep.subr.bf16.mxu1 %v4251_v7 }
 0x65b   : > { %3699 = vmatmul.mubr.msk.bf16.vlgmr.msra.gmra.mrb[52].mxu0 %vm901_vm1, %v2090_v13 }
 0x65c   : > { %3711 = vmatpush3.bf16.msra.mxu0 %v2294_v11  ;;  %3714 = vmatprep.mubr.msk.bf16.mxu0 %vm4252_vm0, %v4251_v7 }
 0x65d   : > { %3712 = vmatprep.subr.bf16.mxu0 %v4251_v7 }
 0x65f   : > { %3705 = vmatpush3.bf16.xpose.msra.mxu1 %v2158_v22 }
 0x660   : > { %3713 = vmatpush3.bf16.msra.mxu0 %v2302_v23  ;;  %3718 = vmatprep.subr.bf16.mxu1 %v4251_v7 }
 0x661   : > { %3726 = vmatprep.subr.bf16.mxu0 %v4251_v7 }
 0x666   : > { %3707 = vmatmul.mubr.msk.bf16.vlgmr.msra.gmra.mrb[52].mxu1 %vm901_vm1, %v2146_v2 }
 0x667   : > { %3719 = vmatpush3.bf16.msra.mxu1 %v2346_v10  ;;  %3722 = vmatprep.mubr.msk.bf16.mxu1 %vm4252_vm0, %v4251_v7 }
 0x668   : > { %3720 = vmatprep.subr.bf16.mxu1 %v4251_v7 }
 0x66b   : > { %3721 = vmatpush3.bf16.msra.mxu1 %v2354_v24 }
 0x66c   : > { %3734 = vmatprep.subr.bf16.mxu1 %v4251_v7 }
 0x6cc   : > { %v4956_v25 = vpop.f32.mrb[40].mxu0 }
 0x6cd   : > { %v3652_v17 = vpop.f32.mrb[41].mxu0 }
 0x6ce   : > { %v4958_v26 = vpop.f32.mrb[42].mxu0 }
 0x6cf   : > { %v3653_v27 = vpop.f32.mrb[43].mxu0 }
 0x6dd   : > { %v4960_v28 = vpop.f32.mrb[44].mxu0 }
 0x6de   : > { %v3668_v30 = vpop.f32.mrb[45].mxu0 }
 0x6df   : > { %v4962_v32 = vpop.f32.mrb[46].mxu0 }
 0x6e0   : > { %v3669_v36 = vpop.f32.mrb[47].mxu0 }
 0x6e4   : > { %v4964_v35 = vpop.f32.mrb[40].mxu1 }
 0x6e5   : > { %v3660_v38 = vpop.f32.mrb[41].mxu1 }
 0x6e6   : > { %v4966_v39 = vpop.f32.mrb[42].mxu1 }
 0x6e7   : > { %v3661_v40 = vpop.f32.mrb[43].mxu1 }
 0x719   : > { %v4968_v42 = vpop.f32.mrb[44].mxu1 }
 0x71a   : > { %v3676_v43 = vpop.f32.mrb[45].mxu1 }
 0x71b   : > { %v4970_v44 = vpop.f32.mrb[46].mxu1 }
 0x71c   : > { %v3677_v46 = vpop.f32.mrb[47].mxu1 }
 0x71e   : > { %v2026_v45 = vpop.f32.mrb[48].mxu0 }
 0x71f   : > { %v3684_v48 = vpop.f32.mrb[49].mxu0  ;;  %v2201_v41 = vsel %vm1102_vm3, %v2026_v45, -inf }
 0x720   : > { %2202 = vmax.xlane.f32.xlu0 %v2201_v41  ;;  %v2029_v47 = vpop.f32.mrb[50].mxu0 }
 0x721   : > { %v3685_v49 = vpop.f32.mrb[51].mxu0  ;;  %v2204_v51 = vsel %vm1102_vm3, %v2029_v47, -inf }
 0x722   : > { %2205 = vmax.xlane.f32.xlu1 %v2204_v51 }
 0x729   : > { %v2082_v56 = vpop.f32.mrb[48].mxu1 }
 0x72a   : > { %v3692_v63 = vpop.f32.mrb[49].mxu1  ;;  %v2207_v3 = vsel %vm1102_vm3, %v2082_v56, -inf }
 0x72b   : > { %v2085_v55 = vpop.f32.mrb[50].mxu1 }
 0x72c   : > { %v3693_v60 = vpop.f32.mrb[51].mxu1  ;;  %v2210_v6 = vsel %vm1102_vm3, %v2085_v55, -inf }
 0x72e   : > { %v2138_v1 = vpop.f32.mrb[52].mxu0 }
 0x72f   : > { %v3700_v54 = vpop.f32.mrb[53].mxu0  ;;  %v2213_v58 = vsel %vm1102_vm3, %v2138_v1, -inf }
 0x730   : > { %2214 = vmax.xlane.f32.xlu1 %v2213_v58  ;;  %v2141_v0 = vpop.f32.mrb[54].mxu0 }
 0x731   : > { %v3701_v16 = vpop.f32.mrb[55].mxu0  ;;  %v2216_v2 = vsel %vm1102_vm3, %v2141_v0, -inf }
 0x732   : > { %2217 = vmax.xlane.f32.xlu0 %v2216_v2 }
 0x736   : > { %2208 = vmax.xlane.f32.xlu0 %v2207_v3 }
 0x739   : > { %v2194_v5 = vpop.f32.mrb[52].mxu1 }
 0x73a   : > { %v3708_v11 = vpop.f32.mrb[53].mxu1  ;;  %2211 = vmax.xlane.f32.xlu0 %v2210_v6  ;;  %v2219_v13 = vsel %vm1102_vm3, %v2194_v5, -inf }
 0x73b   : > { %2220 = vmax.xlane.f32.xlu1 %v2219_v13  ;;  %v2197_v19 = vpop.f32.mrb[54].mxu1 }
 0x73c   : > { %v3709_v22 = vpop.f32.mrb[55].mxu1  ;;  %v2222_v23 = vsel %vm1102_vm3, %v2197_v19, -inf }
 0x73e   : > { %2223 = vmax.xlane.f32.xlu0 %v2222_v23 }
 0x74c   : > { %2449 = vrot.lane.b32.xlu1 %v4648_v20, %s4254_s30 }
 0x754   : > { %2397 = vrot.lane.b32.xlu0 %v4639_v12, %s4254_s30 }
 0x7ad   : > { %v2203_v10 = vpop.xlane.xlu0 %2202 }
 0x7ae   : > { %v2225_v15 = vsub.f32 %v2026_v45, %v2203_v10 }
 0x7af   : > { %v2206_v24 = vpop.xlane.xlu1 %2205 }
 0x7b0   : > { %v2233_v17 = vmul.f32 1.442695, %v2225_v15  ;;  %v2226_v27 = vsub.f32 %v2029_v47, %v2206_v24 }
 0x7b2   : > { %3988 = vpow2.f32 %v2233_v17  ;;  %v2235_v30 = vmul.f32 1.442695, %v2226_v27 }
 0x7b4   : > { %3990 = vpow2.f32 %v2235_v30 }
 0x7bc   : > { %v4984_v36 = vpop.eup %3988 }
 0x7bd   : > { %v2215_v38 = vpop.xlane.xlu1 %2214  ;;  %v2249_v40 = vsel %vm1102_vm3, %v4984_v36, 0.0 }
 0x7be   : > { %v4988_v43 = vpop.eup %3990  ;;  %v2229_v46 = vsub.f32 %v2138_v1, %v2215_v38  ;;  %2250 = vadd.xlane.f32.xlu1 %v2249_v40 }
 0x7bf   : > { %v2218_v48 = vpop.xlane.xlu0 %2217  ;;  %v2252_v45 = vsel %vm1102_vm3, %v4988_v43, 0.0 }
 0x7c0   : > { %v2241_v41 = vmul.f32 1.442695, %v2229_v46  ;;  %v2230_v49 = vsub.f32 %v2141_v0, %v2218_v48  ;;  %2253 = vadd.xlane.f32.xlu0 %v2252_v45 }
 0x7c2   : > { %3992 = vpow2.f32 %v2241_v41  ;;  %v2243_v47 = vmul.f32 1.442695, %v2230_v49 }
 0x7c3   : > { %v2209_v51 = vpop.xlane.xlu0 %2208 }
 0x7c4   : > { %3994 = vpow2.f32 %v2243_v47  ;;  %v2227_v63 = vsub.f32 %v2082_v56, %v2209_v51 }
 0x7c6   : > { %v2237_v60 = vmul.f32 1.442695, %v2227_v63 }
 0x7c7   : > { %v2212_v54 = vpop.xlane.xlu0 %2211 }
 0x7c8   : > { %3996 = vpow2.f32 %v2237_v60  ;;  %v2228_v58 = vsub.f32 %v2085_v55, %v2212_v54  ;;  %v2221_v13 = vpop.xlane.xlu1 %2220 }
 0x7c9   : > { %v2231_v22 = vsub.f32 %v2194_v5, %v2221_v13 }
 0x7ca   : > { %v2239_v16 = vmul.f32 1.442695, %v2228_v58 }
 0x7cb   : > { %v2224_v23 = vpop.xlane.xlu0 %2223  ;;  %v2245_v10 = vmul.f32 1.442695, %v2231_v22 }
 0x7cc   : > { %v4992_v2 = vpop.eup %3992  ;;  %3998 = vpow2.f32 %v2239_v16  ;;  %v2232_v15 = vsub.f32 %v2197_v19, %v2224_v23 }
 0x7cd   : > { %v2261_v1 = vsel %vm1102_vm3, %v4992_v2, 0.0  ;;  %4000 = vpow2.f32 %v2245_v10 }
 0x7ce   : > { %v4996_v3 = vpop.eup %3994  ;;  %2262 = vadd.xlane.f32.xlu1 %v2261_v1  ;;  %v2247_v24 = vmul.f32 1.442695, %v2232_v15 }
 0x7cf   : > { %v2264_v0 = vsel %vm1102_vm3, %v4996_v3, 0.0 }
 0x7d0   : > { %2265 = vadd.xlane.f32.xlu0 %v2264_v0  ;;  %4002 = vpow2.f32 %v2247_v24 }
 0x7d2   : > { %v5000_v6 = vpop.eup %3996 }
 0x7d3   : > { %v2255_v56 = vsel %vm1102_vm3, %v5000_v6, 0.0 }
 0x7d4   : > { %2256 = vadd.xlane.f32.xlu1 %v2255_v56 }
 0x7d6   : > { %v5004_v55 = vpop.eup %3998 }
 0x7d7   : > { %v2258_v11 = vsel %vm1102_vm3, %v5004_v55, 0.0  ;;  %v5012_v17 = vpop.eup %4000 }
 0x7d8   : > { %2259 = vadd.xlane.f32.xlu0 %v2258_v11  ;;  %v2267_v27 = vsel %vm1102_vm3, %v5012_v17, 0.0 }
 0x7da   : > { %v5016_v30 = vpop.eup %4002 }
 0x7db   : > { %v2270_v38 = vsel %vm1102_vm3, %v5016_v30, 0.0 }
 0x7e5   : > { %2451 = vrot.lane.b32.xlu1 %v4745_v21, %s4254_s30 }
 0x7ee   : > { %2399 = vrot.lane.b32.xlu0 %v4729_v61, %s4254_s30 }
 0x809   : > { %2268 = vadd.xlane.f32.xlu1 %v2267_v27 }
 0x80d   : > { %2271 = vadd.xlane.f32.xlu0 %v2270_v38 }
 0x81a   : > { %2600 = vrot.lane.b32.xlu1 %v4574_v34, %s4255_s9 }
 0x81e   : > { %2602 = vrot.lane.b32.xlu1 %v4602_v59, %s4255_s9 }
 0x822   : > { %2712 = vrot.lane.b32.xlu1 %v4592_v57, %s4255_s9 }
 0x823   : > { %2544 = vrot.lane.b32.xlu0 %v4563_v18, %s4255_s9  ;;  %v2450_v18 = vpop.permute.xlu1 %2449 }
 0x826   : > { %2598 = vrot.lane.b32.xlu1 %v4568_v29, %s4255_s9  ;;  %v2398_v29 = vpop.permute.xlu0 %2397 }
 0x827   : > { %2546 = vrot.lane.b32.xlu0 %v4572_v33, %s4255_s9 }
 0x82a   : > { %2714 = vrot.lane.b32.xlu1 %v4618_v62, %s4255_s9 }
 0x82b   : > { %2656 = vrot.lane.b32.xlu0 %v4576_v37, %s4255_s9 }
 0x82e   : > { %2710 = vrot.lane.b32.xlu1 %v4583_v50, %s4255_s9 }
 0x82f   : > { %2542 = vrot.lane.b32.xlu0 %v4570_v31, %s4255_s9 }
 0x833   : > { %2658 = vrot.lane.b32.xlu0 %v4588_v53, %s4255_s9 }
 0x837   : > { %2654 = vrot.lane.b32.xlu0 %v4586_v52, %s4255_s9 }
 0x84b   : > { %v2251_v33 = vpop.xlane.xlu1 %2250 }
 0x84c   : > { %4004 = vrcp.f32 %v2251_v33 }
 0x84d   : > { %v2254_v34 = vpop.xlane.xlu0 %2253 }
 0x84e   : > { %4006 = vrcp.f32 %v2254_v34 }
 0x856   : > { %v4005_v57 = vpop.eup %4004 }
 0x857   : > { %v2281_v59 = vmul.f32 %v4005_v57, %v4984_v36 }
 0x858   : > { %v4007_v37 = vpop.eup %4006 }
 0x859   : > { %v2282_v50 = vmul.f32 %v4007_v37, %v4988_v43 }
 0x85b   : > { %v2263_v62 = vpop.xlane.xlu1 %2262  ;;  %v2289_v31 = vpack.c.bf16 %v2282_v50, %v2281_v59 }
 0x85c   : > { %4008 = vrcp.f32 %v2263_v62 }
 0x85d   : > { %3715 = vmatmul.mubr.msk.bf16.vlgmr.msra.gmra.mrb[56].mxu0 %vm1102_vm3, %v2289_v31  ;;  %v2266_v53 = vpop.xlane.xlu0 %2265 }
 0x85e   : > { %3727 = vmatpush3.bf16.msra.mxu0 %v2398_v29  ;;  %4010 = vrcp.f32 %v2266_v53  ;;  %3730 = vmatprep.mubr.msk.bf16.mxu0 %vm4252_vm0, %v4251_v7 }
 0x85f   : > { %3728 = vmatprep.subr.bf16.mxu0 %v4251_v7 }
 0x861   : > { %v2257_v52 = vpop.xlane.xlu1 %2256 }
 0x862   : > { %4012 = vrcp.f32 %v2257_v52 }
 0x865   : > { %v2260_v5 = vpop.xlane.xlu0 %2259  ;;  %v2452_v60 = vpop.permute.xlu1 %2451 }
 0x866   : > { %v4009_v19 = vpop.eup %4008  ;;  %4014 = vrcp.f32 %v2260_v5  ;;  %v2458_v54 = vsel %vm1198_vm2, %v2452_v60, 0 }
 0x867   : > { %v2285_v40 = vmul.f32 %v4009_v19, %v4992_v2 }
 0x868   : > { %v4011_v36 = vpop.eup %4010 }
 0x869   : > { %v2286_v43 = vmul.f32 %v4011_v36, %v4996_v3  ;;  %v2400_v46 = vpop.permute.xlu0 %2399 }
 0x86a   : > { %v2406_v48 = vsel %vm1198_vm2, %v2400_v46, 0 }
 0x86b   : > { %3729 = vmatpush3.bf16.msra.mxu0 %v2406_v48  ;;  %v2291_v45 = vpack.c.bf16 %v2286_v43, %v2285_v40 }
 0x86c   : > { %3742 = vmatprep.subr.bf16.mxu0 %v4251_v7  ;;  %v4013_v41 = vpop.eup %4012 }
 0x86d   : > { %v2283_v47 = vmul.f32 %v4013_v41, %v5000_v6 }
 0x86e   : > { %3731 = vmatmul.mubr.msk.bf16.vlgmr.msra.gmra.mrb[60].mxu0 %vm1102_vm3, %v2291_v45 }
 0x86f   : > { %3746 = vmatprep.mubr.msk.bf16.mxu0 %vm4252_vm0, %v4251_v7 }
 0x870   : > { %v4015_v49 = vpop.eup %4014 }
 0x871   : > { %v2284_v51 = vmul.f32 %v4015_v49, %v5004_v55 }
 0x873   : > { %v2290_v63 = vpack.c.bf16 %v2284_v51, %v2283_v47 }
 0x875   : > { %3723 = vmatmul.mubr.msk.bf16.vlgmr.msra.gmra.mrb[56].mxu1 %vm1102_vm3, %v2290_v63 }
 0x876   : > { %3735 = vmatpush3.bf16.msra.mxu1 %v2450_v18  ;;  %3738 = vmatprep.mubr.msk.bf16.mxu1 %vm4252_vm0, %v4251_v7 }
 0x877   : > { %3736 = vmatprep.subr.bf16.mxu1 %v4251_v7 }
 0x87a   : > { %3737 = vmatpush3.bf16.msra.mxu1 %v2458_v54 }
 0x87b   : > { %3750 = vmatprep.subr.bf16.mxu1 %v4251_v7 }
 0x896   : > { %v2269_v58 = vpop.xlane.xlu1 %2268 }
 0x897   : > { %4016 = vrcp.f32 %v2269_v58 }
 0x89a   : > { %v2272_v16 = vpop.xlane.xlu0 %2271  ;;  %v2601_v11 = vpop.permute.xlu1 %2600 }
 0x89b   : > { %4018 = vrcp.f32 %v2272_v16  ;;  %v2608_v10 = vsel %vm901_vm1, %v2601_v11, 0 }
 0x89e   : > { %v2545_v2 = vpop.permute.xlu0 %2544  ;;  %v2603_v15 = vpop.permute.xlu1 %2602 }
 0x89f   : > { %v2552_v1 = vsel %vm901_vm1, %v2545_v2, 0  ;;  %v2611_v27 = vsel %vm901_vm1, %v2603_v15, 0 }
 0x8a0   : > { %3743 = vmatpush3.bf16.xpose.msra.mxu0 %v2552_v1 }
 0x8a1   : > { %3744 = vmatprep.subr.bf16.mxu0 %v4251_v7  ;;  %v4017_v0 = vpop.eup %4016 }
 0x8a2   : > { %v2547_v3 = vpop.permute.xlu0 %2546  ;;  %v2287_v56 = vmul.f32 %v4017_v0, %v5012_v17 }
 0x8a3   : > { %v2555_v13 = vsel %vm901_vm1, %v2547_v3, 0 }
 0x8a5   : > { %v4019_v6 = vpop.eup %4018 }
 0x8a6   : > { %v2288_v55 = vmul.f32 %v4019_v6, %v5016_v30  ;;  %v2657_v22 = vpop.permute.xlu0 %2656  ;;  %v2713_v30 = vpop.permute.xlu1 %2712 }
 0x8a7   : > { %v2664_v17 = vsel %vm901_vm1, %v2657_v22, 0  ;;  %v2720_v33 = vsel %vm901_vm1, %v2713_v30, 0 }
 0x8a8   : > { %3745 = vmatpush3.bf16.xpose.msra.mxu0 %v2555_v13  ;;  %v2292_v23 = vpack.c.bf16 %v2288_v55, %v2287_v56 }
 0x8a9   : > { %3758 = vmatprep.subr.bf16.mxu0 %v4251_v7 }
 0x8aa   : > { %3739 = vmatmul.mubr.msk.bf16.vlgmr.msra.gmra.mrb[60].mxu1 %vm1102_vm3, %v2292_v23  ;;  %v2543_v24 = vpop.permute.xlu0 %2542  ;;  %v2599_v29 = vpop.permute.xlu1 %2598 }
 0x8ab   : > { %3751 = vmatpush3.bf16.xpose.msra.mxu1 %v2608_v10  ;;  %3754 = vmatprep.mubr.msk.bf16.mxu1 %vm4252_vm0, %v4251_v7 }
 0x8ac   : > { %3752 = vmatprep.subr.bf16.mxu1 %v4251_v7 }
 0x8ae   : > { %v2659_v38 = vpop.permute.xlu0 %2658  ;;  %v2715_v57 = vpop.permute.xlu1 %2714 }
 0x8af   : > { %3747 = vmatmul.mubr.msk.bf16.vlgmr.msra.gmra.mrb[64].mxu0 %vm901_vm1, %v2543_v24  ;;  %v2667_v18 = vsel %vm901_vm1, %v2659_v38, 0  ;;  %v2723_v37 = vsel %vm901_vm1, %v2715_v57, 0 }
 0x8b0   : > { %3759 = vmatpush3.bf16.xpose.msra.mxu0 %v2664_v17  ;;  %3762 = vmatprep.mubr.msk.bf16.mxu0 %vm4252_vm0, %v4251_v7 }
 0x8b1   : > { %3760 = vmatprep.subr.bf16.mxu0 %v4251_v7 }
 0x8b2   : > { %v2655_v34 = vpop.permute.xlu0 %2654  ;;  %v2711_v59 = vpop.permute.xlu1 %2710 }
 0x8b3   : > { %3753 = vmatpush3.bf16.xpose.msra.mxu1 %v2611_v27 }
 0x8b4   : > { %3766 = vmatprep.subr.bf16.mxu1 %v4251_v7 }
 0x8b8   : > { %3761 = vmatpush3.bf16.xpose.msra.mxu0 %v2667_v18 }
 0x8b9   : > { %3774 = vmatprep.subr.bf16.mxu0 %v4251_v7 }
 0x8ba   : > { %3755 = vmatmul.mubr.msk.bf16.vlgmr.msra.gmra.mrb[64].mxu1 %vm901_vm1, %v2599_v29 }
 0x8bb   : > { %3767 = vmatpush3.bf16.xpose.msra.mxu1 %v2720_v33  ;;  %3770 = vmatprep.mubr.msk.bf16.mxu1 %vm4252_vm0, %v4251_v7 }
 0x8bc   : > { %3768 = vmatprep.subr.bf16.mxu1 %v4251_v7 }
 0x8bf   : > { %3763 = vmatmul.mubr.msk.bf16.vlgmr.msra.gmra.mrb[68].mxu0 %vm901_vm1, %v2655_v34 }
 0x8c0   : > { %3778 = vmatprep.mubr.msk.bf16.mxu0 %vm4252_vm0, %v4251_v7 }
 0x8c3   : > { %3769 = vmatpush3.bf16.xpose.msra.mxu1 %v2723_v37 }
 0x8c4   : > { %3782 = vmatprep.subr.bf16.mxu1 %v4251_v7 }
 0x8ca   : > { %3771 = vmatmul.mubr.msk.bf16.vlgmr.msra.gmra.mrb[68].mxu1 %vm901_vm1, %v2711_v59 }
 0x8cb   : > { %3786 = vmatprep.mubr.msk.bf16.mxu1 %vm4252_vm0, %v4251_v7 }
 0x930   : > { %v5098_v50 = vpop.f32.mrb[56].mxu0 }
 0x931   : > { %v3716_v62 = vpop.f32.mrb[57].mxu0 }
 0x932   : > { %v5100_v31 = vpop.f32.mrb[58].mxu0 }
 0x933   : > { %v3717_v53 = vpop.f32.mrb[59].mxu0 }
 0x941   : > { %v5102_v52 = vpop.f32.mrb[60].mxu0 }
 0x942   : > { %v3732_v5 = vpop.f32.mrb[61].mxu0 }
 0x943   : > { %v5104_v19 = vpop.f32.mrb[62].mxu0 }
 0x944   : > { %v3733_v36 = vpop.f32.mrb[63].mxu0 }
 0x948   : > { %v5106_v40 = vpop.f32.mrb[56].mxu1 }
 0x949   : > { %v3724_v43 = vpop.f32.mrb[57].mxu1 }
 0x94a   : > { %v5108_v46 = vpop.f32.mrb[58].mxu1 }
 0x94b   : > { %v3725_v48 = vpop.f32.mrb[59].mxu1 }
 0x97d   : > { %v5110_v45 = vpop.f32.mrb[60].mxu1 }
 0x97e   : > { %v3740_v41 = vpop.f32.mrb[61].mxu1 }
 0x97f   : > { %v5112_v49 = vpop.f32.mrb[62].mxu1 }
 0x980   : > { %v3741_v47 = vpop.f32.mrb[63].mxu1 }
 0x982   : > { %v2591_v51 = vpop.f32.mrb[64].mxu0 }
 0x983   : > { %v3748_v63 = vpop.f32.mrb[65].mxu0  ;;  %v2766_v60 = vsel %vm1102_vm3, %v2591_v51, -inf }
 0x984   : > { %2767 = vmax.xlane.f32.xlu0 %v2766_v60  ;;  %v2594_v54 = vpop.f32.mrb[66].mxu0 }
 0x985   : > { %v3749_v58 = vpop.f32.mrb[67].mxu0  ;;  %v2769_v16 = vsel %vm1102_vm3, %v2594_v54, -inf }
 0x986   : > { %2770 = vmax.xlane.f32.xlu1 %v2769_v16 }
 0x98d   : > { %v2647_v2 = vpop.f32.mrb[64].mxu1 }
 0x98e   : > { %v3756_v1 = vpop.f32.mrb[65].mxu1  ;;  %v2772_v3 = vsel %vm1102_vm3, %v2647_v2, -inf }
 0x98f   : > { %2773 = vmax.xlane.f32.xlu0 %v2772_v3  ;;  %v2650_v0 = vpop.f32.mrb[66].mxu1 }
 0x990   : > { %v3757_v6 = vpop.f32.mrb[67].mxu1  ;;  %v2775_v55 = vsel %vm1102_vm3, %v2650_v0, -inf }
 0x992   : > { %v2703_v56 = vpop.f32.mrb[68].mxu0 }
 0x993   : > { %2776 = vmax.xlane.f32.xlu0 %v2775_v55  ;;  %v3764_v11 = vpop.f32.mrb[69].mxu0  ;;  %v2778_v13 = vsel %vm1102_vm3, %v2703_v56, -inf }
 0x994   : > { %2779 = vmax.xlane.f32.xlu1 %v2778_v13  ;;  %v2706_v22 = vpop.f32.mrb[70].mxu0 }
 0x995   : > { %v3765_v23 = vpop.f32.mrb[71].mxu0  ;;  %v2781_v10 = vsel %vm1102_vm3, %v2706_v22, -inf }
 0x997   : > { %2782 = vmax.xlane.f32.xlu0 %v2781_v10 }
 0x99d   : > { %v2759_v15 = vpop.f32.mrb[68].mxu1 }
 0x99e   : > { %v3772_v24 = vpop.f32.mrb[69].mxu1  ;;  %v2784_v17 = vsel %vm1102_vm3, %v2759_v15, -inf }
 0x99f   : > { %2785 = vmax.xlane.f32.xlu1 %v2784_v17  ;;  %v2762_v27 = vpop.f32.mrb[70].mxu1 }
 0x9a0   : > { %v3773_v30 = vpop.f32.mrb[71].mxu1  ;;  %v2787_v38 = vsel %vm1102_vm3, %v2762_v27, -inf }
 0x9a1   : > { %2788 = vmax.xlane.f32.xlu0 %v2787_v38 }
 0x9b0   : > { %2858 = vrot.lane.b32.xlu1 %v4627_v4, %s4255_s9 }
 0x9b4   : > { %2860 = vrot.lane.b32.xlu1 %v4633_v9, %s4255_s9 }
 0x9b7   : > { %2910 = vrot.lane.b32.xlu0 %v4631_v8, %s4255_s9 }
 0x9b8   : > { %2912 = vrot.lane.b32.xlu1 %v4642_v14, %s4255_s9 }
 0x9bb   : > { %2962 = vrot.lane.b32.xlu0 %v4639_v12, %s4255_s9 }
 0x9bc   : > { %3014 = vrot.lane.b32.xlu1 %v4648_v20, %s4255_s9 }
 0xa11   : > { %v2768_v18 = vpop.xlane.xlu0 %2767 }
 0xa12   : > { %v2790_v29 = vsub.f32 %v2591_v51, %v2768_v18 }
 0xa13   : > { %v2771_v33 = vpop.xlane.xlu1 %2770 }
 0xa14   : > { %v2798_v34 = vmul.f32 1.442695, %v2790_v29  ;;  %v2791_v4 = vsub.f32 %v2594_v54, %v2771_v33 }
 0xa16   : > { %4020 = vpow2.f32 %v2798_v34  ;;  %v2800_v57 = vmul.f32 1.442695, %v2791_v4 }
 0xa18   : > { %4022 = vpow2.f32 %v2800_v57 }
 0xa1c   : > { %v2774_v9 = vpop.xlane.xlu0 %2773 }
 0xa1d   : > { %v2792_v8 = vsub.f32 %v2647_v2, %v2774_v9 }
 0xa1f   : > { %v2802_v36 = vmul.f32 1.442695, %v2792_v8 }
 0xa20   : > { %v5134_v37 = vpop.eup %4020  ;;  %v2777_v59 = vpop.xlane.xlu0 %2776 }
 0xa21   : > { %v2780_v14 = vpop.xlane.xlu1 %2779  ;;  %v2814_v12 = vsel %vm1102_vm3, %v5134_v37, 0.0  ;;  %v2793_v53 = vsub.f32 %v2650_v0, %v2777_v59 }
 0xa22   : > { %v5138_v62 = vpop.eup %4022  ;;  %v2794_v20 = vsub.f32 %v2703_v56, %v2780_v14  ;;  %2815 = vadd.xlane.f32.xlu1 %v2814_v12 }
 0xa23   : > { %v2817_v5 = vsel %vm1102_vm3, %v5138_v62, 0.0  ;;  %v2804_v47 = vmul.f32 1.442695, %v2793_v53 }
 0xa24   : > { %v2806_v43 = vmul.f32 1.442695, %v2794_v20  ;;  %v2783_v48 = vpop.xlane.xlu0 %2782  ;;  %2818 = vadd.xlane.f32.xlu0 %v2817_v5 }
 0xa25   : > { %v2795_v41 = vsub.f32 %v2706_v22, %v2783_v48 }
 0xa26   : > { %4024 = vpow2.f32 %v2806_v43 }
 0xa27   : > { %v2808_v51 = vmul.f32 1.442695, %v2795_v41  ;;  %4026 = vpow2.f32 %v2802_v36 }
 0xa29   : > { %4028 = vpow2.f32 %v2808_v51 }
 0xa2a   : > { %4030 = vpow2.f32 %v2804_v47 }
 0xa2c   : > { %v2786_v63 = vpop.xlane.xlu1 %2785 }
 0xa2d   : > { %v2796_v60 = vsub.f32 %v2759_v15, %v2786_v63 }
 0xa2e   : > { %v2789_v54 = vpop.xlane.xlu0 %2788 }
 0xa2f   : > { %v2810_v58 = vmul.f32 1.442695, %v2796_v60  ;;  %v2797_v16 = vsub.f32 %v2762_v27, %v2789_v54 }
 0xa30   : > { %v5142_v2 = vpop.eup %4024  ;;  %v2859_v1 = vpop.permute.xlu1 %2858 }
 0xa31   : > { %4032 = vpow2.f32 %v2810_v58  ;;  %v2812_v3 = vmul.f32 1.442695, %v2797_v16  ;;  %3775 = vmatpush3.bf16.msra.mxu0 %v2859_v1  ;;  %v2826_v0 = vsel %vm1102_vm3, %v5142_v2, 0.0  ;;  %v5146_v6 = vpop.eup %4026 }
 0xa32   : > { %v2911_v56 = vpop.permute.xlu0 %2910  ;;  %2827 = vadd.xlane.f32.xlu1 %v2826_v0  ;;  %3776 = vmatprep.subr.bf16.mxu0 %v4251_v7  ;;  %v2820_v10 = vsel %vm1102_vm3, %v5146_v6, 0.0 }
 0xa33   : > { %v5149_v55 = vpop.eup %4028  ;;  %4034 = vpow2.f32 %v2812_v3  ;;  %3783 = vmatpush3.bf16.msra.mxu1 %v2911_v56 }
 0xa34   : > { %v2861_v11 = vpop.permute.xlu1 %2860  ;;  %v2829_v13 = vsel %vm1102_vm3, %v5149_v55, 0.0  ;;  %3784 = vmatprep.subr.bf16.mxu1 %v4251_v7  ;;  %v5154_v22 = vpop.eup %4030 }
 0xa35   : > { %v2867_v23 = vsel %vm1198_vm2, %v2861_v11, 0  ;;  %2830 = vadd.xlane.f32.xlu0 %v2829_v13  ;;  %v2823_v24 = vsel %vm1102_vm3, %v5154_v22, 0.0 }
 0xa36   : > { %3777 = vmatpush3.bf16.msra.mxu0 %v2867_v23  ;;  %2821 = vadd.xlane.f32.xlu1 %v2820_v10 }
 0xa37   : > { %3790 = vmatprep.subr.bf16.mxu0 %v4251_v7 }
 0xa38   : > { %v2913_v15 = vpop.permute.xlu1 %2912 }
 0xa39   : > { %v2919_v17 = vsel %vm1198_vm2, %v2913_v15, 0  ;;  %2824 = vadd.xlane.f32.xlu0 %v2823_v24 }
 0xa3a   : > { %3785 = vmatpush3.bf16.msra.mxu1 %v2919_v17 }
 0xa3b   : > { %v5163_v27 = vpop.eup %4032  ;;  %3798 = vmatprep.subr.bf16.mxu1 %v4251_v7 }
 0xa3c   : > { %v2832_v30 = vsel %vm1102_vm3, %v5163_v27, 0.0 }
 0xa3d   : > { %v5168_v38 = vpop.eup %4034  ;;  %2833 = vadd.xlane.f32.xlu1 %v2832_v30 }
 0xa3e   : > { %v2835_v18 = vsel %vm1102_vm3, %v5168_v38, 0.0 }
 0xa3f   : > { %2836 = vadd.xlane.f32.xlu0 %v2835_v18 }
 0xa4e   : > { %3016 = vrot.lane.b32.xlu1 %v4745_v21, %s4255_s9  ;;  %v2963_v21 = vpop.permute.xlu0 %2962 }
 0xa52   : > { %1946 = vrot.lane.b32.xlu1 %v4958_v26, %s4255_s9 }
 0xa55   : > { %2964 = vrot.lane.b32.xlu0 %v4729_v61, %s4255_s9  ;;  %v3015_v61 = vpop.permute.xlu1 %3014 }
 0xa56   : > { %1950 = vrot.lane.b32.xlu1 %v4966_v39, %s4255_s9 }
 0xa59   : > { %1944 = vrot.lane.b32.xlu0 %v4956_v25, %s4255_s9 }
 0xa5a   : > { %1954 = vrot.lane.b32.xlu1 %v4962_v32, %s4255_s9 }
 0xa5d   : > { %1948 = vrot.lane.b32.xlu0 %v4964_v35, %s4255_s9 }
 0xa5e   : > { %1958 = vrot.lane.b32.xlu1 %v4970_v44, %s4255_s9 }
 0xa61   : > { %1952 = vrot.lane.b32.xlu0 %v4960_v28, %s4255_s9 }
 0xa62   : > { %2511 = vrot.lane.b32.xlu1 %v5100_v31, %s4254_s30 }
 0xa65   : > { %1956 = vrot.lane.b32.xlu0 %v4968_v42, %s4255_s9 }
 0xa66   : > { %2515 = vrot.lane.b32.xlu1 %v5108_v46, %s4254_s30 }
 0xa69   : > { %2509 = vrot.lane.b32.xlu0 %v5098_v50, %s4254_s30 }
 0xa6a   : > { %2519 = vrot.lane.b32.xlu1 %v5104_v19, %s4254_s30 }
 0xa6d   : > { %2513 = vrot.lane.b32.xlu0 %v5106_v40, %s4254_s30 }
 0xa6e   : > { %2523 = vrot.lane.b32.xlu1 %v5112_v49, %s4254_s30 }
 0xa71   : > { %2517 = vrot.lane.b32.xlu0 %v5102_v52, %s4254_s30 }
 0xa75   : > { %2521 = vrot.lane.b32.xlu0 %v5110_v45, %s4254_s30 }
 0xaaf   : > { %v2816_v25 = vpop.xlane.xlu1 %2815 }
 0xab0   : > { %4036 = vrcp.f32 %v2816_v25 }
 0xab1   : > { %v2819_v26 = vpop.xlane.xlu0 %2818 }
 0xab2   : > { %4038 = vrcp.f32 %v2819_v26 }
 0xaba   : > { %v4037_v28 = vpop.eup %4036 }
 0xabb   : > { %v2846_v35 = vmul.f32 %v4037_v28, %v5134_v37 }
 0xabc   : > { %v4039_v32 = vpop.eup %4038 }
 0xabd   : > { %v2847_v39 = vmul.f32 %v4039_v32, %v5138_v62 }
 0xabf   : > { %v2828_v42 = vpop.xlane.xlu1 %2827  ;;  %v2854_v44 = vpack.c.bf16 %v2847_v39, %v2846_v35 }
 0xac1   : > { %3779 = vmatmul.mubr.msk.bf16.vlgmr.msra.gmra.mrb[72].mxu0 %vm1102_vm3, %v2854_v44 }
 0xac2   : > { %3791 = vmatpush3.bf16.msra.mxu0 %v2963_v21  ;;  %v2831_v50 = vpop.xlane.xlu0 %2830  ;;  %3794 = vmatprep.mubr.msk.bf16.mxu0 %vm4252_vm0, %v4251_v7 }
 0xac3   : > { %4040 = vrcp.f32 %v2831_v50  ;;  %v2822_v31 = vpop.xlane.xlu1 %2821  ;;  %3792 = vmatprep.subr.bf16.mxu0 %v4251_v7 }
 0xac4   : > { %4042 = vrcp.f32 %v2828_v42 }
 0xac5   : > { %4044 = vrcp.f32 %v2822_v31 }
 0xac6   : > { %v2825_v52 = vpop.xlane.xlu0 %2824 }
 0xac7   : > { %4046 = vrcp.f32 %v2825_v52 }
 0xaca   : > { %v2834_v19 = vpop.xlane.xlu1 %2833 }
 0xacb   : > { %4048 = vrcp.f32 %v2834_v19 }
 0xacc   : > { %v2837_v40 = vpop.xlane.xlu0 %2836 }
 0xacd   : > { %v4041_v46 = vpop.eup %4040  ;;  %4050 = vrcp.f32 %v2837_v40 }
 0xace   : > { %v4043_v45 = vpop.eup %4042  ;;  %v3017_v49 = vpop.permute.xlu1 %3016  ;;  %v2851_v33 = vmul.f32 %v4041_v46, %v5149_v55 }
 0xacf   : > { %v4045_v29 = vpop.eup %4044  ;;  %v2850_v57 = vmul.f32 %v4043_v45, %v5142_v2  ;;  %v3023_v41 = vsel %vm1198_vm2, %v3017_v49, 0 }
 0xad0   : > { %v2965_v34 = vpop.permute.xlu0 %2964  ;;  %v2848_v37 = vmul.f32 %v4045_v29, %v5146_v6 }
 0xad1   : > { %v4047_v4 = vpop.eup %4046  ;;  %v2971_v9 = vsel %vm1198_vm2, %v2965_v34, 0  ;;  %v2856_v14 = vpack.c.bf16 %v2851_v33, %v2850_v57 }
 0xad2   : > { %v2849_v8 = vmul.f32 %v4047_v4, %v5154_v22  ;;  %v1947_v59 = vpop.permute.xlu1 %1946  ;;  %3793 = vmatpush3.bf16.msra.mxu0 %v2971_v9 }
 0xad3   : > { %1970 = vst.msk [vmem:[%s4798_s13 + $0x8] sm:$0xff] %vm1968_vm4, %v1947_v59 }
 0xad4   : > { %v1945_v12 = vpop.permute.xlu0 %1944  ;;  %v2855_v62 = vpack.c.bf16 %v2849_v8, %v2848_v37 }
 0xad5   : > { %1969 = vst.msk [vmem:[%s4798_s13] sm:$0xff] %vm1968_vm4, %v1945_v12  ;;  %3795 = vmatmul.mubr.msk.bf16.vlgmr.msra.gmra.mrb[76].mxu0 %vm1102_vm3, %v2856_v14  ;;  %v4049_v20 = vpop.eup %4048 }
 0xad6   : > { %v1951_v53 = vpop.permute.xlu1 %1950  ;;  %3787 = vmatmul.mubr.msk.bf16.vlgmr.msra.gmra.mrb[72].mxu1 %vm1102_vm3, %v2855_v62  ;;  %v2852_v48 = vmul.f32 %v4049_v20, %v5163_v27 }
 0xad7   : > { %v4051_v5 = vpop.eup %4050  ;;  %1972 = vst.msk [vmem:[%s4798_s13 + $0x18] sm:$0xff] %vm1968_vm4, %v1951_v53  ;;  %3799 = vmatpush3.bf16.msra.mxu1 %v3015_v61  ;;  %3802 = vmatprep.mubr.msk.bf16.mxu1 %vm4252_vm0, %v4251_v7 }
 0xad8   : > { %v2853_v36 = vmul.f32 %v4051_v5, %v5168_v38  ;;  %v1949_v43 = vpop.permute.xlu0 %1948  ;;  %3800 = vmatprep.subr.bf16.mxu1 %v4251_v7 }
 0xad9   : > { %1971 = vst.msk [vmem:[%s4798_s13 + $0x10] sm:$0xff] %vm1968_vm4, %v1949_v43 }
 0xada   : > { %v1955_v47 = vpop.permute.xlu1 %1954  ;;  %v2857_v63 = vpack.c.bf16 %v2853_v36, %v2852_v48 }
 0xadb   : > { %1974 = vst.msk [vmem:[%s4798_s13 + $0x28] sm:$0xff] %vm1968_vm4, %v1955_v47  ;;  %3801 = vmatpush3.bf16.msra.mxu1 %v3023_v41 }
 0xadc   : > { %v1953_v51 = vpop.permute.xlu0 %1952 }
 0xadd   : > { %1973 = vst.msk [vmem:[%s4798_s13 + $0x20] sm:$0xff] %vm1968_vm4, %v1953_v51 }
 0xade   : > { %v1959_v7 = vpop.permute.xlu1 %1958  ;;  %3803 = vmatmul.mubr.msk.bf16.vlgmr.msra.gmra.mrb[76].mxu1 %vm1102_vm3, %v2857_v63 }
 0xadf   : > { %1976 = vst.msk [vmem:[%s4798_s13 + $0x38] sm:$0xff] %vm1968_vm4, %v1959_v7 }
 0xae0   : > { %v1957_v60 = vpop.permute.xlu0 %1956 }
 0xae1   : > { %1975 = vst.msk [vmem:[%s4798_s13 + $0x30] sm:$0xff] %vm1968_vm4, %v1957_v60 }
 0xae2   : > { %v2512_v54 = vpop.permute.xlu1 %2511 }
 0xae3   : > { %2535 = vst.msk [vmem:[%s4798_s13 + $0x8] sm:$0xff] %vm2533_vm5, %v2512_v54 }
 0xae4   : > { %v2510_v58 = vpop.permute.xlu0 %2509 }
 0xae5   : > { %2534 = vst.msk [vmem:[%s4798_s13] sm:$0xff] %vm2533_vm5, %v2510_v58 }
 0xae6   : > { %v2516_v16 = vpop.permute.xlu1 %2515 }
 0xae7   : > { %2537 = vst.msk [vmem:[%s4798_s13 + $0x18] sm:$0xff] %vm2533_vm5, %v2516_v16 }
 0xae8   : > { %v2514_v2 = vpop.permute.xlu0 %2513 }
 0xae9   : > { %2536 = vst.msk [vmem:[%s4798_s13 + $0x10] sm:$0xff] %vm2533_vm5, %v2514_v2 }
 0xaea   : > { %v2520_v1 = vpop.permute.xlu1 %2519 }
 0xaeb   : > { %2539 = vst.msk [vmem:[%s4798_s13 + $0x28] sm:$0xff] %vm2533_vm5, %v2520_v1 }
 0xaec   : > { %v2518_v3 = vpop.permute.xlu0 %2517 }
 0xaed   : > { %2538 = vst.msk [vmem:[%s4798_s13 + $0x20] sm:$0xff] %vm2533_vm5, %v2518_v3 }
 0xaee   : > { %v2524_v0 = vpop.permute.xlu1 %2523 }
 0xaef   : > { %2541 = vst.msk [vmem:[%s4798_s13 + $0x38] sm:$0xff] %vm2533_vm5, %v2524_v0 }
 0xaf0   : > { %v2522_v6 = vpop.permute.xlu0 %2521 }
 0xaf1   : > { %2540 = vst.msk [vmem:[%s4798_s13 + $0x30] sm:$0xff] %vm2533_vm5, %v2522_v6 }
 0xb94   : > { %v2903_v56 = vpop.f32.mrb[72].mxu0 }
 0xb95   : > { %3074 = vrot.lane.b32.xlu0 %v2903_v56, %s4253_s8  ;;  %v3780_v55 = vpop.f32.mrb[73].mxu0 }
 0xb96   : > { %v2906_v11 = vpop.f32.mrb[74].mxu0 }
 0xb97   : > { %3076 = vrot.lane.b32.xlu1 %v2906_v11, %s4253_s8  ;;  %v3781_v13 = vpop.f32.mrb[75].mxu0 }
 0xba8   : > { %v3007_v22 = vpop.f32.mrb[76].mxu0 }
 0xba9   : > { %3082 = vrot.lane.b32.xlu0 %v3007_v22, %s4253_s8  ;;  %v2955_v23 = vpop.f32.mrb[72].mxu1  ;;  %v3796_v10 = vpop.f32.mrb[77].mxu0 }
 0xbaa   : > { %v3788_v15 = vpop.f32.mrb[73].mxu1  ;;  %v3010_v24 = vpop.f32.mrb[78].mxu0 }
 0xbab   : > { %3084 = vrot.lane.b32.xlu1 %v3010_v24, %s4253_s8  ;;  %v2958_v17 = vpop.f32.mrb[74].mxu1  ;;  %v3797_v27 = vpop.f32.mrb[79].mxu0 }
 0xbac   : > { %v3789_v30 = vpop.f32.mrb[75].mxu1 }
 0xbad   : > { %3078 = vrot.lane.b32.xlu0 %v2955_v23, %s4253_s8 }
 0xbaf   : > { %3080 = vrot.lane.b32.xlu1 %v2958_v17, %s4253_s8 }
 0xbb1   : > { %v3059_v38 = vpop.f32.mrb[76].mxu1 }
 0xbb2   : > { %3086 = vrot.lane.b32.xlu0 %v3059_v38, %s4253_s8  ;;  %v3804_v18 = vpop.f32.mrb[77].mxu1 }
 0xbb3   : > { %v3062_v61 = vpop.f32.mrb[78].mxu1 }
 0xbb4   : > { %3088 = vrot.lane.b32.xlu1 %v3062_v61, %s4253_s8  ;;  %v3805_v21 = vpop.f32.mrb[79].mxu1 }
 0xc07   : > { %v3075_v25 = vpop.permute.xlu0 %3074 }
 0xc08   : > { %3099 = vst.msk [vmem:[%s4798_s13] sm:$0xff] %vm3098_vm6, %v3075_v25 }
 0xc09   : > { %v3077_v26 = vpop.permute.xlu1 %3076 }
 0xc0a   : > { %3100 = vst.msk [vmem:[%s4798_s13 + $0x8] sm:$0xff] %vm3098_vm6, %v3077_v26 }
 0xc1b   : > { %v3083_v28 = vpop.permute.xlu0 %3082 }
 0xc1c   : > { %3103 = vst.msk [vmem:[%s4798_s13 + $0x20] sm:$0xff] %vm3098_vm6, %v3083_v28 }
 0xc1d   : > { %v3085_v32 = vpop.permute.xlu1 %3084 }
 0xc1e   : > { %3104 = vst.msk [vmem:[%s4798_s13 + $0x28] sm:$0xff] %vm3098_vm6, %v3085_v32 }
 0xc1f   : > { %v3079_v35 = vpop.permute.xlu0 %3078 }
 0xc20   : > { %3101 = vst.msk [vmem:[%s4798_s13 + $0x10] sm:$0xff] %vm3098_vm6, %v3079_v35 }
 0xc21   : > { %v3081_v39 = vpop.permute.xlu1 %3080 }
 0xc22   : > { %3102 = vst.msk [vmem:[%s4798_s13 + $0x18] sm:$0xff] %vm3098_vm6, %v3081_v39 }
 0xc24   : > { %v3087_v42 = vpop.permute.xlu0 %3086 }
 0xc25   : > { %3105 = vst.msk [vmem:[%s4798_s13 + $0x30] sm:$0xff] %vm3098_vm6, %v3087_v42 }
 0xc26   : > { %v3089_v44 = vpop.permute.xlu1 %3088 }
 0xc27   : > { %3106 = vst.msk [vmem:[%s4798_s13 + $0x38] sm:$0xff] %vm3098_vm6, %v3089_v44 }
 0xc28   : > { %4179 = shalt.err (!%p4176_p9)
}
 0xc29   : > { %s4180_s8 = scalar_lea.hbm %s5285_s20, 1024  ;;  %s4184_s30 = scalar_lea.hbm %s5341_s6, 2048 }
 0xc2a   : > { %p4181_p0 = scmp.ne.s32.totalorder %s5285_s20, %s4180_s8  ;;  %p4185_p13 = scmp.lt.u32.totalorder %s5285_s20, %s5341_s6 }
 0xc2b   : > { %p4186_p6 = scmp.lt.u32.totalorder %s4184_s30, %s4180_s8  ;;  %p4188_p3 = scmp.lt.u32.totalorder %s4180_s8, %s5285_s20 }
 0xc2c   : > { %p4182_p11 = pnand %p4181_p0, %p4448_p5 }
 0xc2d   : > { %p4187_p10 = por %p4186_p6, %p4185_p13 }
 0xc2e   : > { %p4183_p8 = pneg %p4182_p11 }
 0xc2f   : > { %p4189_p7 = por %p4188_p3, %p4187_p10 }
 0xc31   : > { %p4190_p12 = pnand %p4189_p7, %p4183_p8 }
 0xc33   : > { %4193 = shalt.err (!%p4190_p12)
}
 0xc34   : > { %s4257_s29 = smov 128   ;;  %s4258_s19 = smov 8  }
 0xc35   : > { %3823 = dma.vmem_to_hbm [thread:$0]  (%p4448_p5), %s5287_s27, 1024, %s5285_s20, %s3108_s25, %s4257_s29, %s4257_s29, %s4258_s19  }
 0xc36 PF: > { %s3137_s7 = sand.u32 1, %s4228_s21   ;;  %p5359_p1 = scmp.ne.s32.totalorder %s5346_s28, 0 }
 0xc37   : > { %p5360_p2 = scmp.ge.s32.totalorder %s4240_s24, 2  ;;  %s3138_s10 = scalar_lea.sflag [#allocation4], %s3137_s7 }
 0xc39   : > { %p3840_p4 = pnand %p5360_p2, %p5359_p1 }
 0xc3b   : > { %4223 = dma.done.wait (!%p3840_p4), %s3138_s10, 1024  }
 0xc3c   : > { %4225 = vsyncadd (!%p3840_p4), %s3138_s10, 4294966272  ;;  %p21_p9 = scmp.ge.s32.totalorder %s4434_s18, 4   ;;  %s5361_s21 = smov %s4232_s22 }
 0xc3d   : > { %s5362_s22 = smov %s4236_s23  ;;  %s5363_s23 = smov %s4444_s14 }
 0xc3e   : > { %s5364_s24 = smov %s4434_s18  ;;  %23 = sbr.rel (!%p21_p9) target bundleno = 7 (0x7), region = 107 }
 0xc45   :  { %3143 = vsyncpa [#allocation3], 1 }
 0xc46   :  { %3145 = vsyncpa [#allocation3 + $0x1], 1 }
 0xc47   :  { %3146 = vsyncpa [#allocation6], 1 }
 0xc48   :  { %3147 = vsyncpa [#allocation9], 1 }
 0xc49   :  { %3148 = vsyncpa [#allocation4], 1 }
 0xc4a   :  { %3150 = vsyncpa [#allocation4 + $0x1], 1 }

</bundles_post_ra>
